<compile_context>
chip_gen: v6e
topology: v6e:2x2x1
jax: 0.10.0
libtpu: 0.0.40
codegen_flags: <defaults>
</compile_context>

<pallas_src>
import jax
import jax.numpy as jnp
from jax.experimental import pallas as pl
from jax.experimental.pallas import tpu as pltpu

_BN_EPS = 1e-5


def _make_fused_mlp_kernel(num_layers: int):
    """Fused kernel.

    For layers 0..num_layers-2:   y = h @ W            (MXU, f32)
    For the last layer:           y[:, j] = sum_k h[:, k] * W^T[j, k]   (VPU + XLU)
    Each layer: BatchNorm1d (training-mode batch stats, fused affine) -> ReLU.
    Final: softmax over features.
    """

    def kernel(*refs):
        # refs = (x, w_0, gb_0, w_1, gb_1, ..., out)
        x_ref = refs[0]
        o_ref = refs[1 + 2 * num_layers]

        h = x_ref[...]  # (B, K0) f32
        for li in range(num_layers):
            w_ref = refs[1 + 2 * li]    # layer<last: (K, N); last: (N, K) pre-transposed
            gb_ref = refs[2 + 2 * li]   # (2, N) f32: [gamma; beta]

            if li < num_layers - 1:
                # MXU matmul, f32 accumulation, full f32 precision.
                y = jnp.dot(
                    h, w_ref[...],
                    preferred_element_type=jnp.float32,
                    precision=jax.lax.Precision.HIGHEST,
                )
            else:
                # Last layer: tiny output width (N=2). Avoid the lane-padded
                # (K, 2) MXU matmul; use VPU multiply + cross-lane reduction.
                wt = w_ref[...]                       # (N, K), lane-dense
                B = h.shape[0]
                n_out = wt.shape[0]
                col_ids = jax.lax.broadcasted_iota(jnp.int32, (B, n_out), 1)
                y = jnp.zeros((B, n_out), jnp.float32)
                for j in range(n_out):
                    yj = jnp.sum(h * wt[j:j + 1, :], axis=1, keepdims=True)  # (B, 1)
                    y = jnp.where(col_ids == j, yj, y)

            # BatchNorm1d, training mode: biased batch statistics over axis 0.
            # Linear bias was dropped (it cancels under the mean subtraction).
            mean = jnp.mean(y, axis=0, keepdims=True)
            var = jnp.mean((y - mean) ** 2, axis=0, keepdims=True)
            scale = gb_ref[0:1, :] * jax.lax.rsqrt(var + _BN_EPS)   # (1, N)
            shift = gb_ref[1:2, :] - mean * scale                   # (1, N)
            h = jnp.maximum(y * scale + shift, 0.0)                 # fused affine + ReLU

        # softmax(dim=1) on the final ReLU output.
        m = jnp.max(h, axis=1, keepdims=True)
        e = jnp.exp(h - m)
        denom = jnp.sum(e, axis=1, keepdims=True)
        o_ref[...] = (e / denom).astype(o_ref.dtype)

    return kernel


def fused_mlp_forward(x, packed_params):
    """Run the whole mlp_s forward pass in one gridless Pallas kernel.

    packed_params: list of (w, gb) per layer, pre-packed by pack_kernel_params.
    """
    B = x.shape[0]
    num_layers = len(packed_params)
    out_dim = packed_params[-1][1].shape[1]   # gb of last layer is (2, N)

    args = [x]
    for (w, gb) in packed_params:
        args.append(w)
        args.append(gb)

    vmem_spec = pl.BlockSpec(memory_space=pltpu.MemorySpace.VMEM)
    return pl.pallas_call(
        _make_fused_mlp_kernel(num_layers),
        out_shape=jax.ShapeDtypeStruct((B, out_dim), jnp.float32),
        in_specs=[vmem_spec] * len(args),
        out_specs=vmem_spec,
    )(*args)


def init_params(num_input, key):
    """Deterministic init matching nn.Linear / nn.BatchNorm1d defaults.
    mlp_s dims: [num_input, 1024, 2]. Returns torch-style (w, b, gamma, beta)."""
    dims = [num_input, 1024, 2]
    params = []
    for i in range(len(dims) - 1):
        fan_in, fan_out = dims[i], dims[i + 1]
        key, kw, kb = jax.random.split(key, 3)
        bound = 1.0 / jnp.sqrt(fan_in)
        w = jax.random.uniform(kw, (fan_in, fan_out), jnp.float32, -bound, bound)
        b = jax.random.uniform(kb, (fan_out,), jnp.float32, -bound, bound)
        gamma = jnp.ones((fan_out,), jnp.float32)   # BatchNorm1d default weight
        beta = jnp.zeros((fan_out,), jnp.float32)   # BatchNorm1d default bias
        params.append((w, b, gamma, beta))
    return params


def pack_kernel_params(torch_params):
    """One-time packing (outside the per-call path).

    * Linear bias is dropped: it cancels exactly under BN's mean subtraction.
    * gamma/beta packed into a single (2, N) f32 block per layer.
    * Last layer's weight is pre-transposed to a lane-dense (N, K) block for the
      in-kernel VPU+XLU path.
    """
    packed = []
    num_layers = len(torch_params)
    for li, (w, _b, g, beta) in enumerate(torch_params):
        gb = jnp.stack([g, beta]).astype(jnp.float32)          # (2, N)
        if li == num_layers - 1:
            packed.append((jnp.asarray(w.T, jnp.float32), gb))  # (N, K)
        else:
            packed.append((jnp.asarray(w, jnp.float32), gb))    # (K, N)
    return packed


def mlp_reference(x, torch_params):
    """Pure-JAX reference matching the PyTorch module (training-mode BN)."""
    h = x.astype(jnp.float32)
    for (w, b, g, beta) in torch_params:
        y = jnp.dot(h, w, preferred_element_type=jnp.float32,
                    precision=jax.lax.Precision.HIGHEST) + b
        mean = jnp.mean(y, axis=0, keepdims=True)
        var = jnp.mean((y - mean) ** 2, axis=0, keepdims=True)
        y = (y - mean) * jax.lax.rsqrt(var + _BN_EPS) * g + beta
        h = jnp.maximum(y, 0.0)
    return jax.nn.softmax(h, axis=1)


if __name__ == "__main__":
    num_input = 32
    batch = 8

    key = jax.random.PRNGKey(0)
    key, kx = jax.random.split(key)
    x = jax.random.normal(kx, (batch, num_input), jnp.float32)

    torch_params = init_params(num_input, key)
    packed_params = pack_kernel_params(torch_params)   # hoisted out of the call path

    out = jax.block_until_ready(fused_mlp_forward(x, packed_params))
    ref = mlp_reference(x, torch_params)

    assert out.shape == (batch, 2), out.shape
    assert bool(jnp.all(jnp.isfinite(out)))
    assert jnp.allclose(jnp.sum(out, axis=1), 1.0, atol=1e-4), "softmax rows must sum to 1"
    assert jnp.allclose(out, ref, atol=2e-3, rtol=2e-3), (
        f"max abs diff vs f32 reference: {float(jnp.max(jnp.abs(out - ref)))}"
    )

    print("KERNEL_OK")
</pallas_src>

<mosaic_0001>
module attributes {stable_mosaic.version = 11 : i64} {
  func.func @kernel(%arg0: memref<8x32xf32, #tpu.memory_space<vmem>>, %arg1: memref<32x1024xf32, #tpu.memory_space<vmem>>, %arg2: memref<2x1024xf32, #tpu.memory_space<vmem>>, %arg3: memref<2x1024xf32, #tpu.memory_space<vmem>>, %arg4: memref<2x2xf32, #tpu.memory_space<vmem>>, %arg5: memref<8x2xf32, #tpu.memory_space<vmem>>) attributes {dimension_semantics = [], scalar_prefetch = 0 : i64, scratch_operands = 0 : i64, tpu.core_type = #tpu.core_type<tc>} {
    %c0 = arith.constant 0 : index
    %c0_0 = arith.constant 0 : index
    %0 = vector.load %arg0[%c0, %c0_0] : memref<8x32xf32, #tpu.memory_space<vmem>>, vector<8x32xf32>
    %c0_1 = arith.constant 0 : index
    %c0_2 = arith.constant 0 : index
    %1 = vector.load %arg1[%c0_1, %c0_2] : memref<32x1024xf32, #tpu.memory_space<vmem>>, vector<32x1024xf32>
    %cst = arith.constant dense<0.000000e+00> : vector<8x1024xf32>
    %2 = tpu.matmul %0, %1, %cst {dimension_numbers = #tpu.dot_dimension_numbers<[1], [0], [0], [1], [0, 0, 1, 1], [], []>, precision = #tpu.contract_precision<fp32>} : vector<8x32xf32>, vector<32x1024xf32>, vector<8x1024xf32> -> vector<8x1024xf32>
    %cst_3 = arith.constant dense<0.000000e+00> : vector<1024xf32>
    %3 = vector.multi_reduction <add>, %2, %cst_3 [0] : vector<8x1024xf32> to vector<1024xf32>
    %4 = vector.shape_cast %3 : vector<1024xf32> to vector<1x1024xf32>
    %cst_4 = arith.constant 8.000000e+00 : f32
    %5 = vector.broadcast %cst_4 : f32 to vector<1x1024xf32>
    %6 = arith.divf %4, %5 : vector<1x1024xf32>
    %7 = vector.broadcast %6 : vector<1x1024xf32> to vector<8x1024xf32>
    %8 = arith.subf %2, %7 : vector<8x1024xf32>
    %9 = arith.mulf %8, %8 : vector<8x1024xf32>
    %cst_5 = arith.constant dense<0.000000e+00> : vector<1024xf32>
    %10 = vector.multi_reduction <add>, %9, %cst_5 [0] : vector<8x1024xf32> to vector<1024xf32>
    %11 = vector.shape_cast %10 : vector<1024xf32> to vector<1x1024xf32>
    %cst_6 = arith.constant 8.000000e+00 : f32
    %12 = vector.broadcast %cst_6 : f32 to vector<1x1024xf32>
    %13 = arith.divf %11, %12 : vector<1x1024xf32>
    %c0_7 = arith.constant 0 : index
    %c0_8 = arith.constant 0 : index
    %14 = vector.load %arg2[%c0_7, %c0_8] : memref<2x1024xf32, #tpu.memory_space<vmem>>, vector<1x1024xf32>
    %cst_9 = arith.constant 9.99999974E-6 : f32
    %15 = vector.broadcast %cst_9 : f32 to vector<1x1024xf32>
    %16 = arith.addf %13, %15 : vector<1x1024xf32>
    %17 = math.rsqrt %16 : vector<1x1024xf32>
    %18 = arith.mulf %14, %17 : vector<1x1024xf32>
    %c1 = arith.constant 1 : index
    %c0_10 = arith.constant 0 : index
    %19 = vector.load %arg2[%c1, %c0_10] : memref<2x1024xf32, #tpu.memory_space<vmem>>, vector<1x1024xf32>
    %20 = arith.mulf %6, %18 : vector<1x1024xf32>
    %21 = arith.subf %19, %20 : vector<1x1024xf32>
    %22 = vector.broadcast %18 : vector<1x1024xf32> to vector<8x1024xf32>
    %23 = arith.mulf %2, %22 : vector<8x1024xf32>
    %24 = vector.broadcast %21 : vector<1x1024xf32> to vector<8x1024xf32>
    %25 = arith.addf %23, %24 : vector<8x1024xf32>
    %cst_11 = arith.constant 0.000000e+00 : f32
    %26 = vector.broadcast %cst_11 : f32 to vector<8x1024xf32>
    %27 = arith.maximumf %25, %26 : vector<8x1024xf32>
    %c0_12 = arith.constant 0 : index
    %c0_13 = arith.constant 0 : index
    %28 = vector.load %arg3[%c0_12, %c0_13] : memref<2x1024xf32, #tpu.memory_space<vmem>>, vector<2x1024xf32>
    %29 = tpu.iota {dimensions = array<i32: 1>} : vector<8x2xi32>
    %cst_14 = arith.constant 0.000000e+00 : f32
    %30 = vector.broadcast %cst_14 : f32 to vector<8x2xf32>
    %31 = vector.extract_strided_slice %28 {offsets = [0, 0], sizes = [1, 1024], strides = [1, 1]} : vector<2x1024xf32> to vector<1x1024xf32>
    %32 = vector.broadcast %31 : vector<1x1024xf32> to vector<8x1024xf32>
    %33 = arith.mulf %27, %32 : vector<8x1024xf32>
    %cst_15 = arith.constant dense<0.000000e+00> : vector<8xf32>
    %34 = vector.multi_reduction <add>, %33, %cst_15 [1] : vector<8x1024xf32> to vector<8xf32>
    %35 = vector.shape_cast %34 : vector<8xf32> to vector<8x1xf32>
    %c0_i32 = arith.constant 0 : i32
    %36 = vector.broadcast %c0_i32 : i32 to vector<8x2xi32>
    %37 = arith.cmpi eq, %29, %36 : vector<8x2xi32>
    %38 = vector.shape_cast %35 : vector<8x1xf32> to vector<8x1xf32>
    %39 = vector.broadcast %38 : vector<8x1xf32> to vector<8x2xf32>
    %40 = arith.select %37, %39, %30 : vector<8x2xi1>, vector<8x2xf32>
    %41 = vector.extract_strided_slice %28 {offsets = [1, 0], sizes = [1, 1024], strides = [1, 1]} : vector<2x1024xf32> to vector<1x1024xf32>
    %42 = vector.broadcast %41 : vector<1x1024xf32> to vector<8x1024xf32>
    %43 = arith.mulf %27, %42 : vector<8x1024xf32>
    %cst_16 = arith.constant dense<0.000000e+00> : vector<8xf32>
    %44 = vector.multi_reduction <add>, %43, %cst_16 [1] : vector<8x1024xf32> to vector<8xf32>
    %45 = vector.shape_cast %44 : vector<8xf32> to vector<8x1xf32>
    %c1_i32 = arith.constant 1 : i32
    %46 = vector.broadcast %c1_i32 : i32 to vector<8x2xi32>
    %47 = arith.cmpi eq, %29, %46 : vector<8x2xi32>
    %48 = vector.shape_cast %45 : vector<8x1xf32> to vector<8x1xf32>
    %49 = vector.broadcast %48 : vector<8x1xf32> to vector<8x2xf32>
    %50 = arith.select %47, %49, %40 : vector<8x2xi1>, vector<8x2xf32>
    %cst_17 = arith.constant dense<0.000000e+00> : vector<2xf32>
    %51 = vector.multi_reduction <add>, %50, %cst_17 [0] : vector<8x2xf32> to vector<2xf32>
    %52 = vector.shape_cast %51 : vector<2xf32> to vector<1x2xf32>
    %cst_18 = arith.constant 8.000000e+00 : f32
    %53 = vector.broadcast %cst_18 : f32 to vector<1x2xf32>
    %54 = arith.divf %52, %53 : vector<1x2xf32>
    %55 = vector.broadcast %54 : vector<1x2xf32> to vector<8x2xf32>
    %56 = arith.subf %50, %55 : vector<8x2xf32>
    %57 = arith.mulf %56, %56 : vector<8x2xf32>
    %cst_19 = arith.constant dense<0.000000e+00> : vector<2xf32>
    %58 = vector.multi_reduction <add>, %57, %cst_19 [0] : vector<8x2xf32> to vector<2xf32>
    %59 = vector.shape_cast %58 : vector<2xf32> to vector<1x2xf32>
    %cst_20 = arith.constant 8.000000e+00 : f32
    %60 = vector.broadcast %cst_20 : f32 to vector<1x2xf32>
    %61 = arith.divf %59, %60 : vector<1x2xf32>
    %c0_21 = arith.constant 0 : index
    %c0_22 = arith.constant 0 : index
    %62 = vector.load %arg4[%c0_21, %c0_22] : memref<2x2xf32, #tpu.memory_space<vmem>>, vector<1x2xf32>
    %cst_23 = arith.constant 9.99999974E-6 : f32
    %63 = vector.broadcast %cst_23 : f32 to vector<1x2xf32>
    %64 = arith.addf %61, %63 : vector<1x2xf32>
    %65 = math.rsqrt %64 : vector<1x2xf32>
    %66 = arith.mulf %62, %65 : vector<1x2xf32>
    %c1_24 = arith.constant 1 : index
    %c0_25 = arith.constant 0 : index
    %67 = vector.load %arg4[%c1_24, %c0_25] : memref<2x2xf32, #tpu.memory_space<vmem>>, vector<1x2xf32>
    %68 = arith.mulf %54, %66 : vector<1x2xf32>
    %69 = arith.subf %67, %68 : vector<1x2xf32>
    %70 = vector.broadcast %66 : vector<1x2xf32> to vector<8x2xf32>
    %71 = arith.mulf %50, %70 : vector<8x2xf32>
    %72 = vector.broadcast %69 : vector<1x2xf32> to vector<8x2xf32>
    %73 = arith.addf %71, %72 : vector<8x2xf32>
    %cst_26 = arith.constant 0.000000e+00 : f32
    %74 = vector.broadcast %cst_26 : f32 to vector<8x2xf32>
    %75 = arith.maximumf %73, %74 : vector<8x2xf32>
    %cst_27 = arith.constant dense<0xFF800000> : vector<8xf32>
    %76 = vector.multi_reduction <maximumf>, %75, %cst_27 [1] : vector<8x2xf32> to vector<8xf32>
    %77 = vector.shape_cast %76 : vector<8xf32> to vector<8x1xf32>
    %78 = vector.broadcast %77 : vector<8x1xf32> to vector<8x2xf32>
    %79 = arith.subf %75, %78 : vector<8x2xf32>
    %80 = math.exp %79 : vector<8x2xf32>
    %cst_28 = arith.constant dense<0.000000e+00> : vector<8xf32>
    %81 = vector.multi_reduction <add>, %80, %cst_28 [1] : vector<8x2xf32> to vector<8xf32>
    %82 = vector.shape_cast %81 : vector<8xf32> to vector<8x1xf32>
    %83 = vector.broadcast %82 : vector<8x1xf32> to vector<8x2xf32>
    %84 = arith.divf %80, %83 : vector<8x2xf32>
    %c0_29 = arith.constant 0 : index
    %c0_30 = arith.constant 0 : index
    %85 = vector.load %arg5[%c0_29, %c0_30] : memref<8x2xf32, #tpu.memory_space<vmem>>, vector<8x2xf32>
    tpu.vector_store %arg5[%c0_29, %c0_30], %84 {strides = array<i32>} : memref<8x2xf32, #tpu.memory_space<vmem>>, vector<8x2xf32>,
    return
  }
}

</mosaic_0001>

<bundles_post_ra>
// kernel: tpu_custom_call.1
= control target key start
LH: loop header
LB: loop body
LE: loop exit
PB: predicated region body
PF: predicated region fallthrough
CT: control target
= control target key end

     0   :  { %10 = vsyncpa [#allocation3], 0  ;;  %s3800_s0 = inlined_call_operand.hbm [shape: f32[8,32], index: 0, kind: input, shape index: {}]   ;;  %s3801_s1 = inlined_call_operand.hbm [shape: f32[32,1024], index: 1, kind: input, shape index: {}]   ;;  %s3802_s2 = inlined_call_operand.hbm [shape: f32[2,1024], index: 2, kind: input, shape index: {}]   ;;  %s3803_s3 = inlined_call_operand.hbm [shape: f32[2,1024], index: 3, kind: input, shape index: {}]   ;;  %s3804_s4 = inlined_call_operand.vmem [shape: f32[2,2], index: 4, kind: input, shape index: {}]   ;;  %s3805_s5 = inlined_call_operand.vmem [shape: f32[8,2], index: 5, kind: output, shape index: {}]  }
   0x1   :  { %11 = vsyncpa [#allocation5], 0 }
   0x2   :  { %12 = vsyncpa [#allocation8], 0  ;;  %s3018_s18 = smov [#allocation4]  }
   0x3   :  { %s28_s19 = sshll.u32 %s3018_s18, 4  ;;  %s29_s19 = int_to_ptr.vmem [resolvable:$true] %s28_s19 }
   0x4   :  { %s2940_s20 = scalar_lea.vmem %s29_s19, 4096  ;;  %p2945_p1 = scmp.lt.s32.totalorder %s29_s19, %s29_s19 }
   0x5   :  { %p2941_p0 = scmp.ne.s32.totalorder %s29_s19, %s2940_s20  ;;  %p2946_p2 = scmp.lt.s32.totalorder %s2940_s20, %s2940_s20 }
   0x7   :  { %p2947_p3 = por %p2946_p2, %p2945_p1 }
   0x9   :  { %p2948_p4 = pnand %p2947_p3, %p2941_p0 }
   0xb   :  { %2951 = shalt.err (!%p2948_p4)
}
   0xc   :  { %s3019_s21 = smov 1024   ;;  %s3020_s22 = smov 64  }
   0xd   :  { %34 = dma.hbm_to_vmem [thread:$0]  %s3801_s1, 4096, %s29_s19, [#allocation5], %s3019_s21, %s3019_s21, %s3020_s22  }
   0xe   :  { %s3021_s25 = smov [#allocation2]   ;;  %s3022_s27 = smov [#allocation6]  }
   0xf   :  { %s19_s26 = sshll.u32 %s3021_s25, 4  ;;  %s41_s28 = sshll.u32 %s3022_s27, 4  ;;  %s20_s26 = int_to_ptr.vmem [resolvable:$true] %s19_s26  ;;  %s42_s28 = int_to_ptr.vmem [resolvable:$true] %s41_s28 }
  0x10   :  { %s2960_s29 = scalar_lea.vmem %s20_s26, 128  ;;  %p2965_p6 = scmp.lt.s32.totalorder %s20_s26, %s20_s26 }
  0x11   :  { %p2961_p5 = scmp.ne.s32.totalorder %s20_s26, %s2960_s29  ;;  %p2966_p7 = scmp.lt.s32.totalorder %s2960_s29, %s2960_s29 }
  0x13   :  { %p2967_p8 = por %p2966_p7, %p2965_p6 }
  0x15   :  { %p2968_p9 = pnand %p2967_p8, %p2961_p5 }
  0x17   :  { %2971 = shalt.err (!%p2968_p9)
}
  0x18   :  { %22 = dma.hbm_to_vmem [thread:$0]  %s3800_s0, 128, %s20_s26, [#allocation3]  }
  0x19   :  { %s2980_s7 = scalar_lea.vmem %s42_s28, 256  ;;  %p2985_p11 = scmp.lt.s32.totalorder %s42_s28, %s42_s28 }
  0x1a   :  { %p2981_p10 = scmp.ne.s32.totalorder %s42_s28, %s2980_s7  ;;  %p2986_p12 = scmp.lt.s32.totalorder %s2980_s7, %s2980_s7 }
  0x1c   :  { %p2987_p13 = por %p2986_p12, %p2985_p11 }
  0x1e   :  { %p2988_p0 = pnand %p2987_p13, %p2981_p10 }
  0x20   :  { %2991 = shalt.err (!%p2988_p0)
}
  0x21   :  { %44 = dma.hbm_to_vmem [thread:$0]  %s3802_s2, 256, %s42_s28, [#allocation5]  }
  0x22   :  { %s3023_s9 = smov [#allocation7]  }
  0x23   :  { %s51_s10 = sshll.u32 %s3023_s9, 4  ;;  %s52_s10 = int_to_ptr.vmem [resolvable:$true] %s51_s10 }
  0x24   :  { %s3000_s11 = scalar_lea.vmem %s52_s10, 256  ;;  %p3005_p2 = scmp.lt.s32.totalorder %s52_s10, %s52_s10 }
  0x25   :  { %p3001_p1 = scmp.ne.s32.totalorder %s52_s10, %s3000_s11  ;;  %p3006_p3 = scmp.lt.s32.totalorder %s3000_s11, %s3000_s11 }
  0x27   :  { %p3007_p4 = por %p3006_p3, %p3005_p2 }
  0x29   :  { %p3008_p5 = pnand %p3007_p4, %p3001_p1 }
  0x2b   :  { %3011 = shalt.err (!%p3008_p5)
}
  0x2c   :  { %54 = dma.hbm_to_vmem [thread:$0]  %s3803_s3, 256, %s52_s10, [#allocation8]  }
  0x2d   :  { %3012 = dma.done.wait [#allocation3], 128  }
  0x2e   :  { %3013 = vsyncadd [#allocation3], 4294967168 }
  0x2f   :  { %3014 = dma.done.wait [#allocation5], 4352  }
  0x30   :  { %3015 = vsyncadd [#allocation5], 4294962944 }
  0x31   :  { %3016 = dma.done.wait [#allocation8], 256  }
  0x32   :  { %3017 = vsyncadd [#allocation8], 4294967040  ;;  %v3024_v0 = vmov 0.0   ;;  %v95_v1 = vld [vmem:[#allocation4 + $0xc8] sm:$0xff]  ;;  %v94_v2 = vld [vmem:[#allocation4 + $0xc0] sm:$0xff]  ;;  %vm102_vm0 = vcmask 261120  }
  0x33   :  { %178 = vmatprep.mubr.f32.mxu0 %v3024_v0  ;;  %294 = vmatprep.mubr.f32.mxu1 %v3024_v0  ;;  %v87_v3 = vld [vmem:[#allocation4 + $0x88] sm:$0xff]  ;;  %v3070_v4 = vand.u32 4294901760, %v95_v1  ;;  %v3072_v5 = vand.u32 4294901760, %v94_v2  ;;  %v86_v7 = vld [vmem:[#allocation4 + $0x80] sm:$0xff]  ;;  %v69_v15 = vld [vmem:[#allocation2] sm:$0xff]  ;;  %vm2846_vm3 = vcmask 15360  }
  0x34   :  { %v3074_v6 = vand.u32 4294901760, %v87_v3  ;;  %v79_v8 = vld [vmem:[#allocation4 + $0x48] sm:$0xff]  ;;  %v78_v9 = vld [vmem:[#allocation4 + $0x40] sm:$0xff]  ;;  %v3076_v10 = vand.u32 4294901760, %v86_v7  ;;  %v104_v21 = vsel %vm102_vm0, %v69_v15, 0  ;;  %v97_v56 = vld [vmem:[#allocation4 + $0xd8] sm:$0xff] }
  0x35   :  { %v3078_v11 = vand.u32 4294901760, %v79_v8  ;;  %v3080_v12 = vand.u32 4294901760, %v78_v9  ;;  %v71_v13 = vld [vmem:[#allocation4 + $0x8] sm:$0xff]  ;;  %v70_v14 = vld [vmem:[#allocation4] sm:$0xff]  ;;  %131 = vmatprep.subr.mxu0 %v3070_v4  ;;  %v3086_v17 = vsub.f32 %v95_v1, %v3070_v4  ;;  %v3091_v19 = vsub.f32 %v94_v2, %v3072_v5  ;;  %v96_v57 = vld [vmem:[#allocation4 + $0xd0] sm:$0xff] }
  0x36   :  { %v3083_v16 = vand.u32 4294901760, %v71_v13  ;;  %v3088_v18 = vand.u32 4294901760, %v70_v14  ;;  %133 = vmatpush1.msra.mxu0 %v3072_v5  ;;  %v3095_v20 = vsub.f32 %v87_v3, %v3074_v6  ;;  %v3099_v22 = vsub.f32 %v86_v7, %v3076_v10  ;;  %v89_v58 = vld [vmem:[#allocation4 + $0x98] sm:$0xff]  ;;  %v88_v60 = vld [vmem:[#allocation4 + $0x90] sm:$0xff] }
  0x37   :  { %v3102_v23 = vsub.f32 %v79_v8, %v3078_v11  ;;  %135 = vmatprep.subr.mxu0 %v3074_v6  ;;  %v216_v24 = vand.u32 4294901760, %v3086_v17  ;;  %v222_v25 = vand.u32 4294901760, %v3091_v19  ;;  %v3107_v26 = vand.u32 4294901760, %v104_v21  ;;  %v81_v62 = vld [vmem:[#allocation4 + $0x58] sm:$0xff]  ;;  %v80_v1 = vld [vmem:[#allocation4 + $0x50] sm:$0xff] }
  0x38   :  { %v3110_v27 = vsub.f32 %v78_v9, %v3080_v12  ;;  %137 = vmatpush1.msra.mxu0 %v3076_v10  ;;  %v228_v28 = vand.u32 4294901760, %v3095_v20  ;;  %v234_v29 = vand.u32 4294901760, %v3099_v22  ;;  %v3117_v31 = vsub.f32 %v71_v13, %v3083_v16  ;;  %v73_v3 = vld [vmem:[#allocation4 + $0x18] sm:$0xff]  ;;  %v72_v9 = vld [vmem:[#allocation4 + $0x10] sm:$0xff] }
  0x39   :  { %v240_v30 = vand.u32 4294901760, %v3102_v23  ;;  %139 = vmatprep.subr.mxu0 %v3078_v11  ;;  %v217_v32 = vsub.f32 %v3086_v17, %v216_v24  ;;  %v223_v33 = vsub.f32 %v3091_v19, %v222_v25  ;;  %v3127_v34 = vsub.f32 %v104_v21, %v3107_v26 }
  0x3a   :  { %v246_v35 = vand.u32 4294901760, %v3110_v27  ;;  %141 = vmatpush1.msra.mxu0 %v3080_v12  ;;  %v229_v36 = vsub.f32 %v3095_v20, %v228_v28  ;;  %v235_v37 = vsub.f32 %v3099_v22, %v234_v29  ;;  %v252_v39 = vand.u32 4294901760, %v3117_v31 }
  0x3b   :  { %v241_v38 = vsub.f32 %v3102_v23, %v240_v30  ;;  %143 = vmatprep.subr.mxu0 %v3083_v16  ;;  %v218_v40 = vand.u32 4294901760, %v217_v32  ;;  %v224_v41 = vand.u32 4294901760, %v223_v33  ;;  %v3143_v42 = vand.u32 4294901760, %v3127_v34 }
  0x3c   :  { %v247_v43 = vsub.f32 %v3110_v27, %v246_v35  ;;  %145 = vmatpush1.msra.mxu0 %v3088_v18  ;;  %v230_v44 = vand.u32 4294901760, %v229_v36  ;;  %v236_v45 = vand.u32 4294901760, %v235_v37  ;;  %v253_v46 = vsub.f32 %v3117_v31, %v252_v39 }
  0x3d   :  { %219 = vmatprep.subr.mxu1 %v218_v40  ;;  %328 = vmatprep.subr.mxu0 %v3086_v17  ;;  %v182_v47 = vsub.f32 %v3127_v34, %v3143_v42  ;;  %v242_v48 = vand.u32 4294901760, %v241_v38  ;;  %v3156_v49 = vsub.f32 %v70_v14, %v3088_v18  ;;  %v3172_v59 = vand.u32 4294901760, %v97_v56 }
  0x3e   :  { %225 = vmatpush1.msra.mxu1 %v224_v41  ;;  %v248_v50 = vand.u32 4294901760, %v247_v43  ;;  %v254_v52 = vand.u32 4294901760, %v253_v46  ;;  %v3176_v61 = vand.u32 4294901760, %v96_v57  ;;  %v3180_v63 = vand.u32 4294901760, %v89_v58  ;;  %v91_v46 = vld [vmem:[#allocation4 + $0xa8] sm:$0xff] }
  0x3f   :  { %231 = vmatprep.subr.mxu1 %v230_v44  ;;  %v3158_v51 = vand.u32 4294901760, %v182_v47  ;;  %v258_v53 = vand.u32 4294901760, %v3156_v49  ;;  %v3185_v2 = vand.u32 4294901760, %v88_v60  ;;  %v3190_v7 = vand.u32 4294901760, %v81_v62  ;;  %v99_v44 = vld [vmem:[#allocation4 + $0xe8] sm:$0xff] }
  0x40   :  { %237 = vmatpush1.msra.mxu1 %v236_v45  ;;  %v3193_v8 = vsub.f32 %v97_v56, %v3172_v59  ;;  %v3199_v13 = vsub.f32 %v96_v57, %v3176_v61  ;;  %v3201_v14 = vand.u32 4294901760, %v80_v1  ;;  %v3206_v15 = vand.u32 4294901760, %v73_v3  ;;  %v98_v45 = vld [vmem:[#allocation4 + $0xe0] sm:$0xff] }
  0x41   :  { %184 = vmatmul.mubr.f32.vlgmr.msra.gmra.mxu0 %v3158_v51  ;;  %243 = vmatprep.subr.mxu1 %v242_v48  ;;  %v259_v54 = vsub.f32 %v3156_v49, %v258_v53  ;;  %v3209_v17 = vsub.f32 %v89_v58, %v3180_v63  ;;  %v3302_v47 = vand.u32 4294901760, %v99_v44  ;;  %v90_v48 = vld [vmem:[#allocation4 + $0xa0] sm:$0xff] }
  0x42   :  { %331 = vmatpush1.msra.mxu0 %v3091_v19  ;;  %249 = vmatpush1.msra.mxu1 %v248_v50  ;;  %v3215_v19 = vsub.f32 %v88_v60, %v3185_v2  ;;  %v759_v21 = vand.u32 4294901760, %v3193_v8  ;;  %v83_v50 = vld [vmem:[#allocation4 + $0x68] sm:$0xff]  ;;  %v74_v58 = vld [vmem:[#allocation4 + $0x20] sm:$0xff] }
  0x43   :  { %334 = vmatprep.subr.mxu0 %v3095_v20  ;;  %255 = vmatprep.subr.mxu1 %v254_v52  ;;  %v260_v55 = vand.u32 4294901760, %v259_v54  ;;  %v3217_v20 = vand.u32 4294901760, %v72_v9  ;;  %v3310_v52 = vand.u32 4294901760, %v91_v46  ;;  %v3315_v54 = vand.u32 4294901760, %v90_v48 }
  0x44   :  { %337 = vmatpush1.msra.mxu0 %v3099_v22  ;;  %382 = vmatprep.mubr.f32.mxu0 %v3024_v0  ;;  %v3224_v22 = vsub.f32 %v81_v62, %v3190_v7  ;;  %v3320_v56 = vand.u32 4294901760, %v83_v50  ;;  %v3323_v57 = vsub.f32 %v99_v44, %v3302_v47 }
  0x45   :  { %340 = vmatprep.subr.mxu0 %v3102_v23  ;;  %261 = vmatpush1.msra.mxu1 %v260_v55  ;;  %v3230_v23 = vsub.f32 %v80_v1, %v3201_v14  ;;  %v75_v55 = vld [vmem:[#allocation4 + $0x28] sm:$0xff] }
  0x46   :  { %343 = vmatpush1.msra.mxu0 %v3110_v27  ;;  %296 = vmatmul.mubr.f32.vlgmr.msra.gmra.mxu1 %v3107_v26  ;;  %v3236_v27 = vsub.f32 %v73_v3, %v3206_v15  ;;  %v3336_v1 = vand.u32 4294901760, %v75_v55  ;;  %v3339_v3 = vsub.f32 %v91_v46, %v3310_v52  ;;  %v76_v46 = vld [vmem:[#allocation4 + $0x30] sm:$0xff] }
  0x47   :  { %346 = vmatprep.subr.mxu0 %v3117_v31  ;;  %416 = vmatprep.subr.mxu1 %v3070_v4  ;;  %v789_v31 = vand.u32 4294901760, %v3230_v23 }
  0x48   :  { %349 = vmatpush1.msra.mxu0 %v3156_v49  ;;  %418 = vmatpush1.msra.mxu1 %v3072_v5  ;;  %v795_v32 = vand.u32 4294901760, %v3236_v27  ;;  %v3306_v49 = vand.u32 4294901760, %v98_v45 }
  0x49   :  { %385 = vmatmul.mubr.f32.vlgmr.msra.gmra.mxu0 %v3127_v34  ;;  %420 = vmatprep.subr.mxu1 %v3074_v6  ;;  %v790_v36 = vsub.f32 %v3230_v23, %v789_v31 }
  0x4a   :  { %500 = vmatprep.subr.mxu0 %v216_v24  ;;  %422 = vmatpush1.msra.mxu1 %v3076_v10  ;;  %v765_v24 = vand.u32 4294901760, %v3199_v13  ;;  %v3329_v60 = vsub.f32 %v98_v45, %v3306_v49 }
  0x4b   :  { %504 = vmatpush1.msra.mxu0 %v222_v25  ;;  %424 = vmatprep.subr.mxu1 %v3078_v11  ;;  %v771_v25 = vand.u32 4294901760, %v3209_v17  ;;  %v791_v40 = vand.u32 4294901760, %v790_v36  ;;  %v93_v36 = vld [vmem:[#allocation4 + $0xb8] sm:$0xff] }
  0x4c   :  { %508 = vmatprep.subr.mxu0 %v228_v28  ;;  %426 = vmatpush1.msra.mxu1 %v3080_v12  ;;  %v3241_v28 = vsub.f32 %v72_v9, %v3217_v20  ;;  %v3347_v9 = vand.u32 4294901760, %v74_v58 }
  0x4d   :  { %512 = vmatpush1.msra.mxu0 %v234_v29  ;;  %428 = vmatprep.subr.mxu1 %v3083_v16  ;;  %v777_v29 = vand.u32 4294901760, %v3215_v19 }
  0x4e   :  { %516 = vmatprep.subr.mxu0 %v240_v30  ;;  %430 = vmatpush1.msra.mxu1 %v3088_v18  ;;  %v783_v30 = vand.u32 4294901760, %v3224_v22  ;;  %v801_v33 = vand.u32 4294901760, %v3241_v28 }
  0x4f   :  { %463 = vmatprep.mubr.f32.mxu1 %v3024_v0  ;;  %520 = vmatpush1.msra.mxu0 %v246_v35 }
  0x50   :  { %467 = vmatmul.mubr.f32.vlgmr.msra.gmra.mxu1 %v3143_v42  ;;  %524 = vmatprep.subr.mxu0 %v252_v39  ;;  %v784_v35 = vsub.f32 %v3224_v22, %v783_v30 }
  0x51   :  { %594 = vmatprep.subr.mxu1 %v3070_v4  ;;  %528 = vmatpush1.msra.mxu0 %v258_v53  ;;  %v760_v4 = vsub.f32 %v3193_v8, %v759_v21  ;;  %v82_v53 = vld [vmem:[#allocation4 + $0x60] sm:$0xff] }
  0x52   :  { %561 = vmatprep.mubr.f32.mxu0 %v3024_v0  ;;  %596 = vmatpush1.msra.mxu1 %v3072_v5  ;;  %v766_v5 = vsub.f32 %v3199_v13, %v765_v24  ;;  %v785_v39 = vand.u32 4294901760, %v784_v35  ;;  %v3331_v62 = vand.u32 4294901760, %v82_v53  ;;  %v101_v35 = vld [vmem:[#allocation4 + $0xf8] sm:$0xff] }
  0x53   :  { %563 = vmatmul.mubr.f32.vlgmr.msra.gmra.mxu0 %v3107_v26  ;;  %598 = vmatprep.subr.mxu1 %v3074_v6  ;;  %v772_v6 = vsub.f32 %v3209_v17, %v771_v25 }
  0x54   :  { %674 = vmatprep.subr.mxu0 %v3172_v59  ;;  %600 = vmatpush1.msra.mxu1 %v3076_v10  ;;  %v778_v10 = vsub.f32 %v3215_v19, %v777_v29 }
  0x55   :  { %676 = vmatpush1.msra.mxu0 %v3176_v61  ;;  %602 = vmatprep.subr.mxu1 %v3078_v11  ;;  %v761_v11 = vand.u32 4294901760, %v760_v4  ;;  %v773_v37 = vand.u32 4294901760, %v772_v6 }
  0x56   :  { %678 = vmatprep.subr.mxu0 %v3180_v63  ;;  %604 = vmatpush1.msra.mxu1 %v3080_v12  ;;  %v767_v12 = vand.u32 4294901760, %v766_v5  ;;  %v779_v38 = vand.u32 4294901760, %v778_v10 }
  0x57   :  { %680 = vmatpush1.msra.mxu0 %v3185_v2  ;;  %606 = vmatprep.subr.mxu1 %v3083_v16  ;;  %v796_v16 = vsub.f32 %v3236_v27, %v795_v32 }
  0x58   :  { %682 = vmatprep.subr.mxu0 %v3190_v7  ;;  %608 = vmatpush1.msra.mxu1 %v3088_v18  ;;  %v802_v18 = vsub.f32 %v3241_v28, %v801_v33 }
  0x59   :  { %641 = vmatprep.mubr.f32.mxu1 %v3024_v0  ;;  %684 = vmatpush1.msra.mxu0 %v3201_v14  ;;  %v797_v41 = vand.u32 4294901760, %v796_v16  ;;  %v92_v16 = vld [vmem:[#allocation4 + $0xb0] sm:$0xff] }
  0x5a   :  { %643 = vmatmul.mubr.f32.vlgmr.msra.gmra.mxu1 %v3107_v26  ;;  %686 = vmatprep.subr.mxu0 %v3206_v15  ;;  %v803_v43 = vand.u32 4294901760, %v802_v18  ;;  %v85_v18 = vld [vmem:[#allocation4 + $0x78] sm:$0xff] }
  0x5b   :  { %762 = vmatprep.subr.mxu1 %v761_v11  ;;  %688 = vmatpush1.msra.mxu0 %v3217_v20  ;;  %v3452_v44 = vand.u32 4294901760, %v85_v18 }
  0x5c   :  { %768 = vmatpush1.msra.mxu1 %v767_v12  ;;  %721 = vmatprep.mubr.f32.mxu0 %v3024_v0  ;;  %v100_v12 = vld [vmem:[#allocation4 + $0xf0] sm:$0xff] }
  0x5d   :  { %774 = vmatprep.subr.mxu1 %v773_v37  ;;  %871 = vmatprep.subr.mxu0 %v3193_v8  ;;  %v3345_v8 = vsub.f32 %v90_v48, %v3315_v54  ;;  %v3434_v37 = vand.u32 4294901760, %v101_v35 }
  0x5e   :  { %727 = vmatmul.mubr.f32.vlgmr.msra.gmra.mxu0 %v3158_v51  ;;  %780 = vmatpush1.msra.mxu1 %v779_v38  ;;  %v3438_v38 = vand.u32 4294901760, %v100_v12 }
  0x5f   :  { %874 = vmatpush1.msra.mxu0 %v3199_v13  ;;  %786 = vmatprep.subr.mxu1 %v785_v39  ;;  %v1302_v13 = vand.u32 4294901760, %v3323_v57  ;;  %v3442_v39 = vand.u32 4294901760, %v93_v36  ;;  %v3455_v45 = vsub.f32 %v101_v35, %v3434_v37 }
  0x60   :  { %877 = vmatprep.subr.mxu0 %v3209_v17  ;;  %792 = vmatpush1.msra.mxu1 %v791_v40  ;;  %v3354_v17 = vsub.f32 %v83_v50, %v3320_v56  ;;  %v84_v40 = vld [vmem:[#allocation4 + $0x70] sm:$0xff]  ;;  %v3461_v48 = vsub.f32 %v100_v12, %v3438_v38 }
  0x61   :  { %880 = vmatpush1.msra.mxu0 %v3215_v19  ;;  %798 = vmatprep.subr.mxu1 %v797_v41  ;;  %v3360_v19 = vsub.f32 %v82_v53, %v3331_v62  ;;  %v3447_v41 = vand.u32 4294901760, %v92_v16  ;;  %v3463_v50 = vand.u32 4294901760, %v84_v40 }
  0x62   :  { %883 = vmatprep.subr.mxu0 %v3224_v22  ;;  %804 = vmatpush1.msra.mxu1 %v803_v43  ;;  %v1314_v22 = vand.u32 4294901760, %v3339_v3  ;;  %v77_v43 = vld [vmem:[#allocation4 + $0x38] sm:$0xff] }
  0x63   :  { %837 = vmatprep.mubr.f32.mxu1 %v3024_v0  ;;  %886 = vmatpush1.msra.mxu0 %v3230_v23  ;;  %v3368_v23 = vsub.f32 %v75_v55, %v3336_v1  ;;  %v3468_v53 = vand.u32 4294901760, %v77_v43  ;;  %v3471_v55 = vsub.f32 %v93_v36, %v3442_v39 }
  0x64   :  { %839 = vmatmul.mubr.f32.vlgmr.msra.gmra.mxu1 %v3107_v26  ;;  %889 = vmatprep.subr.mxu0 %v3236_v27  ;;  %v1326_v27 = vand.u32 4294901760, %v3354_v17 }
  0x65   :  { %959 = vmatprep.subr.mxu1 %v3172_v59  ;;  %892 = vmatpush1.msra.mxu0 %v3241_v28  ;;  %v1332_v28 = vand.u32 4294901760, %v3360_v19 }
  0x66   :  { %925 = vmatprep.mubr.f32.mxu0 %v3024_v0  ;;  %961 = vmatpush1.msra.mxu1 %v3176_v61 }
  0x67   :  { %928 = vmatmul.mubr.f32.vlgmr.msra.gmra.mxu0 %v3127_v34  ;;  %963 = vmatprep.subr.mxu1 %v3180_v63  ;;  %v1333_v5 = vsub.f32 %v3360_v19, %v1332_v28 }
  0x68   :  { %1043 = vmatprep.subr.mxu0 %v759_v21  ;;  %965 = vmatpush1.msra.mxu1 %v3185_v2  ;;  %v1308_v21 = vand.u32 4294901760, %v3329_v60 }
  0x69   :  { %1047 = vmatpush1.msra.mxu0 %v765_v24  ;;  %967 = vmatprep.subr.mxu1 %v3190_v7  ;;  %v3373_v24 = vsub.f32 %v74_v58, %v3347_v9  ;;  %v1334_v10 = vand.u32 4294901760, %v1333_v5  ;;  %v3479_v58 = vand.u32 4294901760, %v76_v46 }
  0x6a   :  { %1051 = vmatprep.subr.mxu0 %v771_v25  ;;  %969 = vmatpush1.msra.mxu1 %v3201_v14  ;;  %v1320_v25 = vand.u32 4294901760, %v3345_v8 }
  0x6b   :  { %1055 = vmatpush1.msra.mxu0 %v777_v29  ;;  %971 = vmatprep.subr.mxu1 %v3206_v15  ;;  %v1338_v29 = vand.u32 4294901760, %v3368_v23  ;;  %v1344_v4 = vand.u32 4294901760, %v3373_v24 }
  0x6c   :  { %1059 = vmatprep.subr.mxu0 %v783_v30  ;;  %973 = vmatpush1.msra.mxu1 %v3217_v20  ;;  %v1327_v30 = vsub.f32 %v3354_v17, %v1326_v27 }
  0x6d   :  { %1006 = vmatprep.mubr.f32.mxu1 %v3024_v0  ;;  %1063 = vmatpush1.msra.mxu0 %v789_v31 }
  0x6e   :  { %1010 = vmatmul.mubr.f32.vlgmr.msra.gmra.mxu1 %v3143_v42  ;;  %1067 = vmatprep.subr.mxu0 %v795_v32  ;;  %v1328_v32 = vand.u32 4294901760, %v1327_v30 }
  0x6f   :  { %1137 = vmatprep.subr.mxu1 %v3172_v59  ;;  %1071 = vmatpush1.msra.mxu0 %v801_v33  ;;  %v1303_v59 = vsub.f32 %v3323_v57, %v1302_v13 }
  0x70   :  { %1104 = vmatprep.mubr.f32.mxu0 %v3024_v0  ;;  %1139 = vmatpush1.msra.mxu1 %v3176_v61  ;;  %v1309_v61 = vsub.f32 %v3329_v60, %v1308_v21 }
  0x71   :  { %1106 = vmatmul.mubr.f32.vlgmr.msra.gmra.mxu0 %v3107_v26  ;;  %1141 = vmatprep.subr.mxu1 %v3180_v63  ;;  %v1315_v63 = vsub.f32 %v3339_v3, %v1314_v22 }
  0x72   :  { %1217 = vmatprep.subr.mxu0 %v3302_v47  ;;  %1143 = vmatpush1.msra.mxu1 %v3185_v2  ;;  %v1321_v2 = vsub.f32 %v3345_v8, %v1320_v25 }
  0x73   :  { %1219 = vmatpush1.msra.mxu0 %v3306_v49  ;;  %1145 = vmatprep.subr.mxu1 %v3190_v7  ;;  %v1304_v7 = vand.u32 4294901760, %v1303_v59  ;;  %v1316_v31 = vand.u32 4294901760, %v1315_v63 }
  0x74   :  { %1221 = vmatprep.subr.mxu0 %v3310_v52  ;;  %1147 = vmatpush1.msra.mxu1 %v3201_v14  ;;  %v1310_v14 = vand.u32 4294901760, %v1309_v61  ;;  %v1322_v6 = vand.u32 4294901760, %v1321_v2 }
  0x75   :  { %1223 = vmatpush1.msra.mxu0 %v3315_v54  ;;  %1149 = vmatprep.subr.mxu1 %v3206_v15  ;;  %v1339_v15 = vsub.f32 %v3368_v23, %v1338_v29 }
  0x76   :  { %1225 = vmatprep.subr.mxu0 %v3320_v56  ;;  %1151 = vmatpush1.msra.mxu1 %v3217_v20  ;;  %v1345_v20 = vsub.f32 %v3373_v24, %v1344_v4 }
  0x77   :  { %1184 = vmatprep.mubr.f32.mxu1 %v3024_v0  ;;  %1227 = vmatpush1.msra.mxu0 %v3331_v62  ;;  %v1340_v33 = vand.u32 4294901760, %v1339_v15 }
  0x78   :  { %1186 = vmatmul.mubr.f32.vlgmr.msra.gmra.mxu1 %v3107_v26  ;;  %1229 = vmatprep.subr.mxu0 %v3336_v1  ;;  %v1346_v11 = vand.u32 4294901760, %v1345_v20 }
  0x79   :  { %1305 = vmatprep.subr.mxu1 %v1304_v7  ;;  %1231 = vmatpush1.msra.mxu0 %v3347_v9 }
  0x7a   :  { %1311 = vmatpush1.msra.mxu1 %v1310_v14  ;;  %1264 = vmatprep.mubr.f32.mxu0 %v3024_v0 }
  0x7b   :  { %1317 = vmatprep.subr.mxu1 %v1316_v31  ;;  %1414 = vmatprep.subr.mxu0 %v3323_v57  ;;  %v3477_v57 = vsub.f32 %v92_v16, %v3447_v41 }
  0x7c   :  { %1270 = vmatmul.mubr.f32.vlgmr.msra.gmra.mxu0 %v3158_v51  ;;  %1323 = vmatpush1.msra.mxu1 %v1322_v6 }
  0x7d   :  { %1417 = vmatpush1.msra.mxu0 %v3329_v60  ;;  %1329 = vmatprep.subr.mxu1 %v1328_v32  ;;  %v1845_v60 = vand.u32 4294901760, %v3455_v45 }
  0x7e   :  { %1420 = vmatprep.subr.mxu0 %v3339_v3  ;;  %1335 = vmatpush1.msra.mxu1 %v1334_v10  ;;  %v3486_v3 = vsub.f32 %v85_v18, %v3452_v44 }
  0x7f   :  { %1423 = vmatpush1.msra.mxu0 %v3345_v8  ;;  %1341 = vmatprep.subr.mxu1 %v1340_v33  ;;  %v3492_v8 = vsub.f32 %v84_v40, %v3463_v50 }
  0x80   :  { %1426 = vmatprep.subr.mxu0 %v3354_v17  ;;  %1347 = vmatpush1.msra.mxu1 %v1346_v11  ;;  %v1857_v17 = vand.u32 4294901760, %v3471_v55 }
  0x81   :  { %1380 = vmatprep.mubr.f32.mxu1 %v3024_v0  ;;  %1429 = vmatpush1.msra.mxu0 %v3360_v19  ;;  %v3500_v19 = vsub.f32 %v77_v43, %v3468_v53 }
  0x82   :  { %1382 = vmatmul.mubr.f32.vlgmr.msra.gmra.mxu1 %v3107_v26  ;;  %1432 = vmatprep.subr.mxu0 %v3368_v23  ;;  %v1869_v23 = vand.u32 4294901760, %v3486_v3 }
  0x83   :  { %1502 = vmatprep.subr.mxu1 %v3302_v47  ;;  %1435 = vmatpush1.msra.mxu0 %v3373_v24  ;;  %v1875_v24 = vand.u32 4294901760, %v3492_v8 }
  0x84   :  { %1468 = vmatprep.mubr.f32.mxu0 %v3024_v0  ;;  %1504 = vmatpush1.msra.mxu1 %v3306_v49 }
  0x85   :  { %1471 = vmatmul.mubr.f32.vlgmr.msra.gmra.mxu0 %v3127_v34  ;;  %1506 = vmatprep.subr.mxu1 %v3310_v52  ;;  %v1876_v61 = vsub.f32 %v3492_v8, %v1875_v24 }
  0x86   :  { %1586 = vmatprep.subr.mxu0 %v1302_v13  ;;  %1508 = vmatpush1.msra.mxu1 %v3315_v54  ;;  %v1851_v13 = vand.u32 4294901760, %v3461_v48 }
  0x87   :  { %1590 = vmatpush1.msra.mxu0 %v1308_v21  ;;  %1510 = vmatprep.subr.mxu1 %v3320_v56  ;;  %v3505_v21 = vsub.f32 %v76_v46, %v3479_v58  ;;  %v1877_v2 = vand.u32 4294901760, %v1876_v61 }
  0x88   :  { %1594 = vmatprep.subr.mxu0 %v1314_v22  ;;  %1512 = vmatpush1.msra.mxu1 %v3331_v62  ;;  %v1863_v22 = vand.u32 4294901760, %v3477_v57 }
  0x89   :  { %1598 = vmatpush1.msra.mxu0 %v1320_v25  ;;  %1514 = vmatprep.subr.mxu1 %v3336_v1  ;;  %v1881_v25 = vand.u32 4294901760, %v3500_v19  ;;  %v1887_v59 = vand.u32 4294901760, %v3505_v21 }
  0x8a   :  { %1602 = vmatprep.subr.mxu0 %v1326_v27  ;;  %1516 = vmatpush1.msra.mxu1 %v3347_v9  ;;  %v1870_v27 = vsub.f32 %v3486_v3, %v1869_v23 }
  0x8b   :  { %1549 = vmatprep.mubr.f32.mxu1 %v3024_v0  ;;  %1606 = vmatpush1.msra.mxu0 %v1332_v28 }
  0x8c   :  { %1553 = vmatmul.mubr.f32.vlgmr.msra.gmra.mxu1 %v3143_v42  ;;  %1610 = vmatprep.subr.mxu0 %v1338_v29  ;;  %v1871_v29 = vand.u32 4294901760, %v1870_v27 }
  0x8d   :  { %1680 = vmatprep.subr.mxu1 %v3302_v47  ;;  %1614 = vmatpush1.msra.mxu0 %v1344_v4  ;;  %v1846_v47 = vsub.f32 %v3455_v45, %v1845_v60 }
  0x8e   :  { %1647 = vmatprep.mubr.f32.mxu0 %v3024_v0  ;;  %1682 = vmatpush1.msra.mxu1 %v3306_v49  ;;  %v1852_v49 = vsub.f32 %v3461_v48, %v1851_v13 }
  0x8f   :  { %1649 = vmatmul.mubr.f32.vlgmr.msra.gmra.mxu0 %v3107_v26  ;;  %1684 = vmatprep.subr.mxu1 %v3310_v52  ;;  %v1858_v52 = vsub.f32 %v3471_v55, %v1857_v17 }
  0x90   :  { %1760 = vmatprep.subr.mxu0 %v3434_v37  ;;  %1686 = vmatpush1.msra.mxu1 %v3315_v54  ;;  %v1864_v54 = vsub.f32 %v3477_v57, %v1863_v22 }
  0x91   :  { %1762 = vmatpush1.msra.mxu0 %v3438_v38  ;;  %1688 = vmatprep.subr.mxu1 %v3320_v56  ;;  %v1847_v56 = vand.u32 4294901760, %v1846_v47  ;;  %v1859_v28 = vand.u32 4294901760, %v1858_v52 }
  0x92   :  { %1764 = vmatprep.subr.mxu0 %v3442_v39  ;;  %1690 = vmatpush1.msra.mxu1 %v3331_v62  ;;  %v1853_v62 = vand.u32 4294901760, %v1852_v49  ;;  %v1865_v63 = vand.u32 4294901760, %v1864_v54 }
  0x93   :  { %1766 = vmatpush1.msra.mxu0 %v3447_v41  ;;  %1692 = vmatprep.subr.mxu1 %v3336_v1  ;;  %v1882_v1 = vsub.f32 %v3500_v19, %v1881_v25 }
  0x94   :  { %1768 = vmatprep.subr.mxu0 %v3452_v44  ;;  %1694 = vmatpush1.msra.mxu1 %v3347_v9  ;;  %v1888_v9 = vsub.f32 %v3505_v21, %v1887_v59 }
  0x95   :  { %1727 = vmatprep.mubr.f32.mxu1 %v3024_v0  ;;  %1770 = vmatpush1.msra.mxu0 %v3463_v50  ;;  %v1883_v4 = vand.u32 4294901760, %v1882_v1 }
  0x96   :  { %1729 = vmatmul.mubr.f32.vlgmr.msra.gmra.mxu1 %v3107_v26  ;;  %1772 = vmatprep.subr.mxu0 %v3468_v53  ;;  %v1889_v7 = vand.u32 4294901760, %v1888_v9 }
  0x97   :  { %1848 = vmatprep.subr.mxu1 %v1847_v56  ;;  %1774 = vmatpush1.msra.mxu0 %v3479_v58 }
  0x98   :  { %1854 = vmatpush1.msra.mxu1 %v1853_v62  ;;  %1807 = vmatprep.mubr.f32.mxu0 %v3024_v0 }
  0x99   :  { %1860 = vmatprep.subr.mxu1 %v1859_v28  ;;  %1957 = vmatprep.subr.mxu0 %v3455_v45 }
  0x9a   :  { %1813 = vmatmul.mubr.f32.vlgmr.msra.gmra.mxu0 %v3158_v51  ;;  %1866 = vmatpush1.msra.mxu1 %v1865_v63 }
  0x9b   :  { %1960 = vmatpush1.msra.mxu0 %v3461_v48  ;;  %1872 = vmatprep.subr.mxu1 %v1871_v29 }
  0x9c   :  { %1963 = vmatprep.subr.mxu0 %v3471_v55  ;;  %1878 = vmatpush1.msra.mxu1 %v1877_v2 }
  0x9d   :  { %1966 = vmatpush1.msra.mxu0 %v3477_v57  ;;  %1884 = vmatprep.subr.mxu1 %v1883_v4 }
  0x9e   :  { %1969 = vmatprep.subr.mxu0 %v3486_v3  ;;  %1890 = vmatpush1.msra.mxu1 %v1889_v7 }
  0x9f   :  { %1923 = vmatprep.mubr.f32.mxu1 %v3024_v0  ;;  %1972 = vmatpush1.msra.mxu0 %v3492_v8 }
  0xa0   :  { %1925 = vmatmul.mubr.f32.vlgmr.msra.gmra.mxu1 %v3107_v26  ;;  %1975 = vmatprep.subr.mxu0 %v3500_v19 }
  0xa1   :  { %2045 = vmatprep.subr.mxu1 %v3434_v37  ;;  %1978 = vmatpush1.msra.mxu0 %v3505_v21 }
  0xa2   :  { %2011 = vmatprep.mubr.f32.mxu0 %v3024_v0  ;;  %2047 = vmatpush1.msra.mxu1 %v3438_v38 }
  0xa3   :  { %2014 = vmatmul.mubr.f32.vlgmr.msra.gmra.mxu0 %v3127_v34  ;;  %2049 = vmatprep.subr.mxu1 %v3442_v39 }
  0xa4   :  { %2129 = vmatprep.subr.mxu0 %v1845_v60  ;;  %2051 = vmatpush1.msra.mxu1 %v3447_v41 }
  0xa5   :  { %2133 = vmatpush1.msra.mxu0 %v1851_v13  ;;  %2053 = vmatprep.subr.mxu1 %v3452_v44 }
  0xa6   :  { %2137 = vmatprep.subr.mxu0 %v1857_v17  ;;  %2055 = vmatpush1.msra.mxu1 %v3463_v50 }
  0xa7   :  { %2141 = vmatpush1.msra.mxu0 %v1863_v22  ;;  %2057 = vmatprep.subr.mxu1 %v3468_v53 }
  0xa8   :  { %2145 = vmatprep.subr.mxu0 %v1869_v23  ;;  %2059 = vmatpush1.msra.mxu1 %v3479_v58 }
  0xa9   :  { %2092 = vmatprep.mubr.f32.mxu1 %v3024_v0  ;;  %2149 = vmatpush1.msra.mxu0 %v1875_v24 }
  0xaa   :  { %2096 = vmatmul.mubr.f32.vlgmr.msra.gmra.mxu1 %v3143_v42  ;;  %2153 = vmatprep.subr.mxu0 %v1881_v25 }
  0xab   :  { %2223 = vmatprep.subr.mxu1 %v3434_v37  ;;  %2157 = vmatpush1.msra.mxu0 %v1887_v59 }
  0xac   :  { %2190 = vmatprep.mubr.f32.mxu0 %v3024_v0  ;;  %2225 = vmatpush1.msra.mxu1 %v3438_v38 }
  0xad   :  { %2192 = vmatmul.mubr.f32.vlgmr.msra.gmra.mxu0 %v3107_v26  ;;  %2227 = vmatprep.subr.mxu1 %v3442_v39 }
  0xae   :  { %2229 = vmatpush1.msra.mxu1 %v3447_v41  ;;  %2270 = vmatprep.mubr.f32.mxu1 %v3024_v0 }
  0xaf   :  { %2231 = vmatprep.subr.mxu1 %v3452_v44 }
  0xb0   :  { %2233 = vmatpush1.msra.mxu1 %v3463_v50 }
  0xb1   :  { %2235 = vmatprep.subr.mxu1 %v3468_v53 }
  0xb2   :  { %2237 = vmatpush1.msra.mxu1 %v3479_v58 }
  0xb3   :  { %2272 = vmatmul.mubr.f32.vlgmr.msra.gmra.mxu1 %v3107_v26 }
 0x101   :  { %v185_v34 = vpop.f32.mrf.mxu0 }
 0x103   :  { %v187_v42 = vpop.f32.mrf.mxu0 }
 0x106   :  { %v297_v51 = vpop.f32.mrf.mxu1 }
 0x107   :  { %v298_v43 = vadd.f32 %v297_v51, %v185_v34 }
 0x108   :  { %v299_v14 = vpop.f32.mrf.mxu1 }
 0x109   :  { %v386_v30 = vpop.f32.mrf.mxu0  ;;  %v300_v18 = vadd.f32 %v299_v14, %v187_v42 }
 0x10a   :  { %v387_v55 = vadd.f32 %v386_v30, %v298_v43 }
 0x10b   :  { %v388_v5 = vpop.f32.mrf.mxu0 }
 0x10c   :  { %v389_v46 = vadd.f32 %v388_v5, %v300_v18 }
 0x110   :  { %v468_v31 = vpop.f32.mrf.mxu1 }
 0x111   :  { %v469_v8 = vadd.f32 %v468_v31, %v387_v55 }
 0x112   :  { %v470_v6 = vpop.f32.mrf.mxu1 }
 0x113   :  { %v564_v15 = vpop.f32.mrf.mxu0  ;;  %v471_v57 = vadd.f32 %v470_v6, %v389_v46 }
 0x114   :  { %v565_v23 = vadd.f32 %v564_v15, %v469_v8 }
 0x115   :  { %v566_v0 = vpop.f32.mrf.mxu0 }
 0x116   :  { %v567_v17 = vadd.f32 %v566_v0, %v471_v57 }
 0x11a   :  { %v644_v20 = vpop.f32.mrf.mxu1 }
 0x11b   :  { %v3607_v54 = vadd.f32 %v644_v20, %v565_v23 }
 0x11c   :  { %v646_v10 = vpop.f32.mrf.mxu1 }
 0x11d   :  { %v3603_v49 = vadd.f32 %v646_v10, %v567_v17  ;;  %v2278_v9 = vrot.slane %v3607_v54, 4 }
 0x11e   :  { %v728_v32 = vpop.f32.mrf.mxu0 }
 0x11f   :  { %v2284_v62 = vrot.slane %v3603_v49, 4  ;;  %v2279_v30 = vadd.f32 %v2278_v9, %v3607_v54 }
 0x120   :  { %v730_v33 = vpop.f32.mrf.mxu0 }
 0x121   :  { %v2285_v7 = vadd.f32 %v2284_v62, %v3603_v49  ;;  %v2280_v10 = vrot.slane %v2279_v30, 2 }
 0x123   :  { %v2286_v15 = vrot.slane %v2285_v7, 2 }
 0x124   :  { %v840_v11 = vpop.f32.mrf.mxu1 }
 0x125   :  { %v841_v39 = vadd.f32 %v840_v11, %v728_v32 }
 0x126   :  { %v842_v12 = vpop.f32.mrf.mxu1 }
 0x127   :  { %v929_v35 = vpop.f32.mrf.mxu0  ;;  %v843_v16 = vadd.f32 %v842_v12, %v730_v33  ;;  %v2287_v12 = vadd.f32 %v2286_v15, %v2285_v7 }
 0x128   :  { %v930_v48 = vadd.f32 %v929_v35, %v841_v39 }
 0x129   :  { %v931_v36 = vpop.f32.mrf.mxu0 }
 0x12a   :  { %v932_v44 = vadd.f32 %v931_v36, %v843_v16  ;;  %v2281_v16 = vadd.f32 %v2280_v10, %v2279_v30 }
 0x12c   :  { %v2282_v46 = vrot.slane %v2281_v16, 1 }
 0x12e   :  { %v1011_v37 = vpop.f32.mrf.mxu1  ;;  %v2283_v8 = vadd.f32 %v2282_v46, %v2281_v16 }
 0x12f   :  { %v1012_v58 = vadd.f32 %v1011_v37, %v930_v48 }
 0x130   :  { %v1013_v38 = vpop.f32.mrf.mxu1 }
 0x131   :  { %v1107_v26 = vpop.f32.mrf.mxu0  ;;  %v1014_v50 = vadd.f32 %v1013_v38, %v932_v44 }
 0x132   :  { %v1108_v19 = vadd.f32 %v1107_v26, %v1012_v58 }
 0x133   :  { %v1109_v40 = vpop.f32.mrf.mxu0 }
 0x134   :  { %v1110_v13 = vadd.f32 %v1109_v40, %v1014_v50  ;;  %v2288_v40 = vrot.slane %v2287_v12, 1 }
 0x138   :  { %v1187_v41 = vpop.f32.mrf.mxu1 }
 0x139   :  { %v3605_v52 = vadd.f32 %v1187_v41, %v1108_v19 }
 0x13a   :  { %v1189_v53 = vpop.f32.mrf.mxu1 }
 0x13b   :  { %v3601_v21 = vadd.f32 %v1189_v53, %v1110_v13  ;;  %v2290_v28 = vrot.slane %v3605_v52, 4  ;;  %v2289_v53 = vadd.f32 %v2288_v40, %v2287_v12 }
 0x13c   :  { %v1271_v45 = vpop.f32.mrf.mxu0 }
 0x13d   :  { %v2296_v56 = vrot.slane %v3601_v21, 4  ;;  %v2291_v42 = vadd.f32 %v2290_v28, %v3605_v52  ;;  %v3627_v19 = vmul.f32 0.125, %v2289_v53 }
 0x13e   :  { %v1273_v60 = vpop.f32.mrf.mxu0 }
 0x13f   :  { %v2297_v4 = vadd.f32 %v2296_v56, %v3601_v21  ;;  %v2292_v20 = vrot.slane %v2291_v42, 2  ;;  %v2336_v28 = vsub.f32 %v3603_v49, %v3627_v19 }
 0x141   :  { %v2298_v5 = vrot.slane %v2297_v4, 2  ;;  %v2293_v26 = vadd.f32 %v2292_v20, %v2291_v42 }
 0x142   :  { %v1383_v3 = vpop.f32.mrf.mxu1 }
 0x143   :  { %v1384_v24 = vadd.f32 %v1383_v3, %v1271_v45  ;;  %v2299_v35 = vadd.f32 %v2298_v5, %v2297_v4  ;;  %v2294_v44 = vrot.slane %v2293_v26, 1 }
 0x144   :  { %v1385_v22 = vpop.f32.mrf.mxu1 }
 0x145   :  { %v1472_v47 = vpop.f32.mrf.mxu0  ;;  %v1386_v59 = vadd.f32 %v1385_v22, %v1273_v60  ;;  %v2300_v39 = vrot.slane %v2299_v35, 1  ;;  %v2295_v60 = vadd.f32 %v2294_v44, %v2293_v26 }
 0x146   :  { %v1473_v61 = vadd.f32 %v1472_v47, %v1384_v24 }
 0x147   :  { %v1474_v27 = vpop.f32.mrf.mxu0  ;;  %v2301_v50 = vadd.f32 %v2300_v39, %v2299_v35  ;;  %v3629_v23 = vmul.f32 0.125, %v2295_v60 }
 0x148   :  { %v1475_v29 = vadd.f32 %v1474_v27, %v1386_v59  ;;  %v3631_v59 = vmul.f32 0.125, %v2283_v8 }
 0x149   :  { %v3625_v13 = vmul.f32 0.125, %v2301_v50 }
 0x14b   :  { %v2338_v56 = vsub.f32 %v3601_v21, %v3625_v13 }
 0x14c   :  { %v1554_v25 = vpop.f32.mrf.mxu1 }
 0x14d   :  { %v1555_v2 = vadd.f32 %v1554_v25, %v1473_v61 }
 0x14e   :  { %v1556_v1 = vpop.f32.mrf.mxu1 }
 0x14f   :  { %v1650_v63 = vpop.f32.mrf.mxu0  ;;  %v1557_v34 = vadd.f32 %v1556_v1, %v1475_v29 }
 0x150   :  { %v1651_v14 = vadd.f32 %v1650_v63, %v1555_v2  ;;  %v2337_v63 = vsub.f32 %v3605_v52, %v3629_v23  ;;  %v2335_v2 = vsub.f32 %v3607_v54, %v3631_v59 }
 0x151   :  { %v1652_v51 = vpop.f32.mrf.mxu0 }
 0x152   :  { %v1653_v6 = vadd.f32 %v1652_v51, %v1557_v34  ;;  %v2346_v34 = vmul.f32 %v2338_v56, %v2338_v56  ;;  %v2345_v5 = vmul.f32 %v2337_v63, %v2337_v63 }
 0x156   :  { %v1730_v31 = vpop.f32.mrf.mxu1 }
 0x157   :  { %v3617_v0 = vadd.f32 %v1730_v31, %v1651_v14  ;;  %v2344_v14 = vmul.f32 %v2336_v28, %v2336_v28 }
 0x158   :  { %v1732_v32 = vpop.f32.mrf.mxu1 }
 0x159   :  { %v2302_v33 = vrot.slane %v3617_v0, 4  ;;  %v3620_v11 = vadd.f32 %v1732_v32, %v1653_v6  ;;  %v2343_v6 = vmul.f32 %v2335_v2, %v2335_v2  ;;  %v2369_v32 = vrot.slane %v2346_v34, 4 }
 0x15a   :  { %v1814_v43 = vpop.f32.mrf.mxu0  ;;  %v2357_v35 = vrot.slane %v2344_v14, 4 }
 0x15b   :  { %v2303_v36 = vadd.f32 %v2302_v33, %v3617_v0  ;;  %v2308_v37 = vrot.slane %v3620_v11, 4  ;;  %v2370_v39 = vadd.f32 %v2369_v32, %v2346_v34 }
 0x15c   :  { %v1816_v57 = vpop.f32.mrf.mxu0  ;;  %v2358_v44 = vadd.f32 %v2357_v35, %v2344_v14 }
 0x15d   :  { %v2304_v38 = vrot.slane %v2303_v36, 2  ;;  %v2309_v18 = vadd.f32 %v2308_v37, %v3620_v11 }
 0x15f   :  { %v2310_v41 = vrot.slane %v2309_v18, 2  ;;  %v2305_v45 = vadd.f32 %v2304_v38, %v2303_v36  ;;  %v2363_v36 = vrot.slane %v2345_v5, 4  ;;  %v2351_v38 = vrot.slane %v2343_v6, 4 }
 0x160   :  { %v1926_v58 = vpop.f32.mrf.mxu1 }
 0x161   :  { %v2311_v48 = vadd.f32 %v2310_v41, %v2309_v18  ;;  %v2306_v3 = vrot.slane %v2305_v45, 1  ;;  %v1927_v25 = vadd.f32 %v1926_v58, %v1814_v43  ;;  %v2352_v53 = vadd.f32 %v2351_v38, %v2343_v6 }
 0x162   :  { %v1928_v22 = vpop.f32.mrf.mxu1 }
 0x163   :  { %v2312_v55 = vrot.slane %v2311_v48, 1  ;;  %v2015_v47 = vpop.f32.mrf.mxu0  ;;  %v2307_v24 = vadd.f32 %v2306_v3, %v2305_v45  ;;  %v1929_v62 = vadd.f32 %v1928_v22, %v1816_v57  ;;  %v2364_v45 = vadd.f32 %v2363_v36, %v2345_v5 }
 0x164   :  { %v2016_v29 = vadd.f32 %v2015_v47, %v1927_v25  ;;  %v2359_v3 = vrot.slane %v2358_v44, 2 }
 0x165   :  { %v2313_v17 = vadd.f32 %v2312_v55, %v2311_v48  ;;  %v2017_v1 = vpop.f32.mrf.mxu0  ;;  %v3641_v9 = vmul.f32 0.125, %v2307_v24  ;;  %v2371_v55 = vrot.slane %v2370_v39, 2  ;;  %v2365_v8 = vrot.slane %v2364_v45, 2 }
 0x166   :  { %v2018_v51 = vadd.f32 %v2017_v1, %v1929_v62  ;;  %v2353_v24 = vrot.slane %v2352_v53, 2  ;;  %v2360_v28 = vadd.f32 %v2359_v3, %v2358_v44 }
 0x167   :  { %v3635_v27 = vmul.f32 0.125, %v2313_v17  ;;  %v2339_v31 = vsub.f32 %v3617_v0, %v3641_v9  ;;  %v2372_v25 = vadd.f32 %v2371_v55, %v2370_v39  ;;  %v2366_v1 = vadd.f32 %v2365_v8, %v2364_v45 }
 0x169   :  { %v2340_v42 = vsub.f32 %v3620_v11, %v3635_v27  ;;  %v2347_v37 = vmul.f32 %v2339_v31, %v2339_v31  ;;  %v2367_v14 = vrot.slane %v2366_v1, 1 }
 0x16a   :  { %v2097_v61 = vpop.f32.mrf.mxu1 }
 0x16b   :  { %v2098_v30 = vadd.f32 %v2097_v61, %v2016_v29  ;;  %v2348_v10 = vmul.f32 %v2340_v42, %v2340_v42  ;;  %v2375_v46 = vrot.slane %v2347_v37, 4 }
 0x16c   :  { %v2099_v4 = vpop.f32.mrf.mxu1 }
 0x16d   :  { %v2193_v7 = vpop.f32.mrf.mxu0  ;;  %v2100_v15 = vadd.f32 %v2099_v4, %v2018_v51  ;;  %v2381_v40 = vrot.slane %v2348_v10, 4  ;;  %v2376_v17 = vadd.f32 %v2375_v46, %v2347_v37  ;;  %v2354_v4 = vadd.f32 %v2353_v24, %v2352_v53 }
 0x16e   :  { %v2194_v33 = vadd.f32 %v2193_v7, %v2098_v30  ;;  %v2373_v7 = vrot.slane %v2372_v25, 1  ;;  %v2361_v30 = vrot.slane %v2360_v28, 1 }
 0x16f   :  { %v2195_v20 = vpop.f32.mrf.mxu0  ;;  %v2382_v57 = vadd.f32 %v2381_v40, %v2348_v10  ;;  %v2377_v63 = vrot.slane %v2376_v17, 2  ;;  %v2355_v6 = vrot.slane %v2354_v4, 1 }
 0x170   :  { %v2196_v26 = vadd.f32 %v2195_v20, %v2100_v15  ;;  %v2374_v20 = vadd.f32 %v2373_v7, %v2372_v25  ;;  %v2362_v35 = vadd.f32 %v2361_v30, %v2360_v28 }
 0x171   :  { %v2383_v56 = vrot.slane %v2382_v57, 2  ;;  %v2378_v5 = vadd.f32 %v2377_v63, %v2376_v17  ;;  %v2356_v38 = vadd.f32 %v2355_v6, %v2354_v4  ;;  %v3025_v4 = vmov 1966171168  }
 0x172   :  { %v2400_v44 = vmul.f32 0.125, %v2362_v35  ;;  %v2437_v7 = vunpack.c.l.s4 %v3025_v4 }
 0x173   :  { %v2273_v12 = vpop.f32.mrf.mxu1  ;;  %v2384_v34 = vadd.f32 %v2383_v56, %v2382_v57  ;;  %v2379_v36 = vrot.slane %v2378_v5, 1  ;;  %v2399_v53 = vmul.f32 0.125, %v2356_v38 }
 0x174   :  { %v3649_v16 = vadd.f32 %v2273_v12, %v2194_v33  ;;  %v2368_v12 = vadd.f32 %v2367_v14, %v2366_v1  ;;  %v2409_v3 = vadd.f32 1e-05, %v2400_v44  ;;  %v2438_v14 = vunpack.c.0.s8 %v2437_v7 }
 0x175   :  { %v2275_v18 = vpop.f32.mrf.mxu1  ;;  %v2385_v32 = vrot.slane %v2384_v34, 1  ;;  %v2380_v46 = vadd.f32 %v2379_v36, %v2378_v5  ;;  %v2408_v24 = vadd.f32 1e-05, %v2399_v53 }
 0x176   :  { %v2314_v41 = vrot.slane %v3649_v16, 4  ;;  %v3652_v43 = vadd.f32 %v2275_v18, %v2196_v26  ;;  %v2402_v18 = vmul.f32 0.125, %v2374_v20  ;;  %v2401_v45 = vmul.f32 0.125, %v2368_v12 }
 0x177   :  { %v2386_v39 = vadd.f32 %v2385_v32, %v2384_v34  ;;  %v2403_v17 = vmul.f32 0.125, %v2380_v46  ;;  %v2439_v34 = vlaneseq }
 0x178   :  { %v2315_v48 = vadd.f32 %v2314_v41, %v3649_v16  ;;  %v2320_v50 = vrot.slane %v3652_v43, 4  ;;  %v2411_v55 = vadd.f32 1e-05, %v2402_v18  ;;  %v2410_v8 = vadd.f32 1e-05, %v2401_v45 }
 0x179   :  { %v2404_v57 = vmul.f32 0.125, %v2386_v39  ;;  %v2440_v5 = vshrl.u32 %v2439_v34, 7 }
 0x17a   :  { %v2316_v58 = vrot.slane %v2315_v48, 2  ;;  %v2321_v60 = vadd.f32 %v2320_v50, %v3652_v43  ;;  %2910 = vrsqrt.f32 %v2411_v55 }
 0x17b   :  { %v2413_v25 = vadd.f32 1e-05, %v2404_v57  ;;  %2912 = vrsqrt.f32 %v2409_v3  ;;  %v3668_v55 = vsub.s32 1, %v2440_v5  ;;  %v3670_v57 = vsub.s32 2, %v2440_v5 }
 0x17c   :  { %v2317_v22 = vadd.f32 %v2316_v58, %v2315_v48  ;;  %v2322_v47 = vrot.slane %v2321_v60, 2  ;;  %2914 = vrsqrt.f32 %v2410_v8  ;;  %v3676_v3 = vsub.s32 5, %v2440_v5 }
 0x17d   :  { %2916 = vrsqrt.f32 %v2408_v24  ;;  %v3678_v8 = vsub.s32 6, %v2440_v5 }
 0x17e   :  { %v2318_v62 = vrot.slane %v2317_v22, 1  ;;  %v2323_v61 = vadd.f32 %v2322_v47, %v2321_v60  ;;  %2918 = vrsqrt.f32 %v2413_v25 }
 0x180   :  { %v2319_v29 = vadd.f32 %v2318_v62, %v2317_v22  ;;  %v2324_v2 = vrot.slane %v2323_v61, 1 }
 0x182   :  { %v3657_v42 = vmul.f32 0.125, %v2319_v29  ;;  %v2325_v51 = vadd.f32 %v2324_v2, %v2323_v61  ;;  %v2412_v61 = vadd.f32 1e-05, %v2403_v17  ;;  %v3680_v17 = vsub.s32 7, %v2440_v5 }
 0x184   :  { %v2341_v31 = vsub.f32 %v3649_v16, %v3657_v42  ;;  %v3661_v15 = vmul.f32 0.125, %v2325_v51  ;;  %2920 = vrsqrt.f32 %v2412_v61 }
 0x186   :  { %v2349_v10 = vmul.f32 %v2341_v31, %v2341_v31  ;;  %v2342_v33 = vsub.f32 %v3652_v43, %v3661_v15 }
 0x187   :  { %v2911_v51 = vpop.eup %2910 }
 0x188   :  { %v2387_v37 = vrot.slane %v2349_v10, 4  ;;  %v2350_v26 = vmul.f32 %v2342_v33, %v2342_v33  ;;  %v2913_v30 = vpop.eup %2912  ;;  %v2441_v33 = vsub.s32 %v2438_v14, %v2440_v5 }
 0x189   :  { %v2915_v31 = vpop.eup %2914 }
 0x18a   :  { %v2388_v40 = vadd.f32 %v2387_v37, %v2349_v10  ;;  %v2393_v41 = vrot.slane %v2350_v26, 4  ;;  %v2917_v6 = vpop.eup %2916  ;;  %v2433_v20 = vcombine.low %v2915_v31, %v2911_v51 }
 0x18b   :  { %v2919_v32 = vpop.eup %2918  ;;  %v2432_v10 = vcombine.low %v2917_v6, %v2913_v30 }
 0x18c   :  { %v2389_v48 = vrot.slane %v2388_v40, 2  ;;  %v2394_v50 = vadd.f32 %v2393_v41, %v2350_v26  ;;  %v2449_v36 = vrot.slane %v2433_v20, %v2441_v33 }
 0x18d   :  { %v2442_v38 = vrot.slane %v2432_v10, %v2441_v33  ;;  %v3706_v10 = vld [vmem:[#allocation7 + $0x8] sm:$0xff] }
 0x18e   :  { %v2390_v58 = vadd.f32 %v2389_v48, %v2388_v40  ;;  %v2395_v60 = vrot.slane %v2394_v50, 2  ;;  %v2407_v48 = vld [vmem:[#allocation6] ss:$2 sm:$0xff] }
 0x18f   :  { %v2464_v39 = vcombine.low %v2442_v38, %v2449_v36 }
 0x190   :  { %v2391_v22 = vrot.slane %v2390_v58, 1  ;;  %v2396_v47 = vadd.f32 %v2395_v60, %v2394_v50  ;;  %v3666_v50 = vsub.s32 0, %v2440_v5  ;;  %v3674_v60 = vsub.s32 4, %v2440_v5 }
 0x191   :  { %v2921_v35 = vpop.eup %2920  ;;  %v2472_v45 = vrot.slane %v2464_v39, %v2441_v33 }
 0x192   :  { %v2392_v56 = vadd.f32 %v2391_v22, %v2390_v58  ;;  %v2397_v62 = vrot.slane %v2396_v47, 1  ;;  %v2434_v37 = vcombine.low %v2921_v35, %v2919_v32  ;;  %v3672_v58 = vsub.s32 3, %v2440_v5  ;;  %v3704_v32 = vld [vmem:[#allocation7] sm:$0xff] }
 0x193   :  { %v2675_v35 = vrot.slane %v3704_v32, %v3674_v60  ;;  %v2679_v36 = vrot.slane %v3704_v32, %v3678_v8  ;;  %v2691_v39 = vrot.slane %v3706_v10, %v3674_v60 }
 0x194   :  { %v2405_v28 = vmul.f32 0.125, %v2392_v56  ;;  %v2398_v1 = vadd.f32 %v2397_v62, %v2396_v47  ;;  %v2456_v40 = vrot.slane %v2434_v37, %v2441_v33  ;;  %v2683_v37 = vrot.slane %v3706_v10, %v3666_v50 }
 0x196   :  { %v2414_v63 = vadd.f32 1e-05, %v2405_v28  ;;  %v2406_v29 = vmul.f32 0.125, %v2398_v1 }
 0x198   :  { %v2415_v2 = vadd.f32 1e-05, %v2406_v29  ;;  %2922 = vrsqrt.f32 %v2414_v63 }
 0x19a   :  { %2924 = vrsqrt.f32 %v2415_v2 }
 0x1a5   :  { %v2923_v12 = vpop.eup %2922 }
 0x1a7   :  { %v2925_v26 = vpop.eup %2924 }
 0x1a8   :  { %v2435_v18 = vcombine.low %v2923_v12, %v2925_v26  ;;  %v2687_v26 = vrot.slane %v3706_v10, %v3670_v57 }
 0x1aa   :  { %v2463_v41 = vrot.slane %v2435_v18, %v2441_v33  ;;  %v2484_v18 = vld [vmem:[#allocation6 + $0x1] ss:$2 sm:$0xff] }
 0x1ac   :  { %v2465_v44 = vcombine.low %v2456_v40, %v2463_v41  ;;  %v2695_v40 = vrot.slane %v3706_v10, %v3678_v8 }
 0x1ae   :  { %v2479_v46 = vrot.slane %v2465_v44, %v2441_v33 }
 0x1b0   :  { %v2480_v53 = vcombine.low %v2472_v45, %v2479_v46  ;;  %v2715_v46 = vrot.slane %v2675_v35, %v3666_v50 }
 0x1b2   :  { %v2482_v22 = vmul.f32 %v2480_v53, %v2407_v48  ;;  %v2719_v48 = vrot.slane %v2679_v36, %v3666_v50  ;;  %v2723_v53 = vrot.slane %v2683_v37, %v3666_v50 }
 0x1b4   :  { %v2489_v47 = vrot.slane %v2482_v22, %v3666_v50  ;;  %v2493_v24 = vrot.slane %v2482_v22, %v3668_v55  ;;  %v2497_v25 = vrot.slane %v2482_v22, %v3670_v57  ;;  %v2501_v56 = vrot.slane %v2482_v22, %v3672_v58 }
 0x1b5   :  { %v2505_v62 = vrot.slane %v2482_v22, %v3674_v60  ;;  %v2509_v61 = vrot.slane %v2482_v22, %v3676_v3  ;;  %v3689_v28 = vrot.slane %v2482_v22, %v3678_v8  ;;  %v3692_v1 = vrot.slane %v2482_v22, %v3680_v17 }
 0x1b6   :  { %v2526_v63 = vmul.f32 %v2489_v47, %v3631_v59  ;;  %v2527_v29 = vmul.f32 %v2493_v24, %v3627_v19  ;;  %v2528_v2 = vmul.f32 %v2497_v25, %v3629_v23  ;;  %v2529_v4 = vmul.f32 %v2501_v56, %v3625_v13 }
 0x1b7   :  { %v2530_v7 = vmul.f32 %v2505_v62, %v3641_v9  ;;  %v2531_v51 = vmul.f32 %v2509_v61, %v3635_v27  ;;  %v2532_v30 = vmul.f32 %v3689_v28, %v3657_v42  ;;  %v2533_v14 = vmul.f32 %v3692_v1, %v3661_v15 }
 0x1b8   :  { %v2542_v5 = vcombine.low %v2526_v63, %v2527_v29  ;;  %v2543_v31 = vcombine.low %v2528_v2, %v2529_v4  ;;  %v2667_v42 = vrot.slane %v3704_v32, %v3666_v50  ;;  %v2671_v15 = vrot.slane %v3704_v32, %v3670_v57 }
 0x1b9   :  { %v2544_v6 = vcombine.low %v2530_v7, %v2531_v51  ;;  %v2545_v59 = vcombine.low %v2532_v30, %v2533_v14  ;;  %v2758_v22 = vrot.slane %v3704_v32, %v3668_v55  ;;  %v2762_v29 = vrot.slane %v3704_v32, %v3672_v58 }
 0x1ba   :  { %v2552_v20 = vrot.slane %v2542_v5, %v2441_v33  ;;  %v2559_v19 = vrot.slane %v2543_v31, %v2441_v33  ;;  %v2707_v44 = vrot.slane %v2667_v42, %v3666_v50  ;;  %v2711_v45 = vrot.slane %v2671_v15, %v3666_v50 }
 0x1bb   :  { %v2566_v23 = vrot.slane %v2544_v6, %v2441_v33  ;;  %v2573_v13 = vrot.slane %v2545_v59, %v2441_v33  ;;  %v2766_v2 = vrot.slane %v3704_v32, %v3676_v3  ;;  %v2770_v4 = vrot.slane %v3704_v32, %v3680_v17 }
 0x1bc   :  { %v2574_v9 = vcombine.low %v2552_v20, %v2559_v19  ;;  %v2593_v7 = vmul.f32 %v2489_v47, %v3607_v54  ;;  %v2594_v51 = vmul.f32 %v2493_v24, %v3603_v49  ;;  %v2595_v30 = vmul.f32 %v2497_v25, %v3605_v52 }
 0x1bd   :  { %v2575_v27 = vcombine.low %v2566_v23, %v2573_v13  ;;  %v2596_v14 = vmul.f32 %v2501_v56, %v3601_v21  ;;  %v2597_v20 = vmul.f32 %v2505_v62, %v3617_v0  ;;  %v2774_v49 = vrot.slane %v3706_v10, %v3668_v55 }
 0x1be   :  { %v2582_v12 = vrot.slane %v2574_v9, %v2441_v33  ;;  %v2598_v25 = vmul.f32 %v2509_v61, %v3620_v11  ;;  %v2798_v32 = vrot.slane %v2758_v22, %v3668_v55  ;;  %v2802_v13 = vrot.slane %v2762_v29, %v3668_v55 }
 0x1bf   :  { %v2589_v38 = vrot.slane %v2575_v27, %v2441_v33  ;;  %v3730_v33 = vrot.slane %v2687_v26, %v3666_v50  ;;  %v2599_v9 = vmul.f32 %v3689_v28, %v3649_v16  ;;  %v2778_v15 = vrot.slane %v3706_v10, %v3672_v58 }
 0x1c0   :  { %v2600_v36 = vmul.f32 %v3692_v1, %v3652_v43  ;;  %v2731_v1 = vrot.slane %v2691_v39, %v3666_v50 }
 0x1c1   :  { %v2590_v41 = vcombine.low %v2582_v12, %v2589_v38  ;;  %v2806_v12 = vrot.slane %v2766_v2, %v3668_v55  ;;  %v2810_v38 = vrot.slane %v2770_v4, %v3668_v55 }
 0x1c3   :  { %v2592_v63 = vsub.f32 %v2484_v18, %v2590_v41 }
 0x1c5   :  { %v2605_v5 = vrot.slane %v2592_v63, %v3666_v50  ;;  %v2609_v31 = vrot.slane %v2592_v63, %v3668_v55  ;;  %v2613_v6 = vrot.slane %v2592_v63, %v3670_v57  ;;  %v2617_v59 = vrot.slane %v2592_v63, %v3672_v58 }
 0x1c6   :  { %v2621_v19 = vrot.slane %v2592_v63, %v3674_v60  ;;  %v2625_v54 = vrot.slane %v2592_v63, %v3676_v3  ;;  %v2629_v56 = vrot.slane %v2592_v63, %v3678_v8  ;;  %v2633_v27 = vrot.slane %v2592_v63, %v3680_v17 }
 0x1c7   :  { %v2642_v52 = vadd.f32 %v2605_v5, %v2593_v7  ;;  %v2643_v47 = vadd.f32 %v2609_v31, %v2594_v51  ;;  %v2644_v21 = vadd.f32 %v2613_v6, %v2595_v30  ;;  %v2645_v24 = vadd.f32 %v2617_v59, %v2596_v14 }
 0x1c8   :  { %v2646_v57 = vadd.f32 %v2621_v19, %v2597_v20  ;;  %v2647_v42 = vadd.f32 %v2625_v54, %v2598_v25  ;;  %v2648_v37 = vadd.f32 %v2629_v56, %v2599_v9  ;;  %v2649_v22 = vadd.f32 %v2633_v27, %v2600_v36 }
 0x1c9   :  { %v2650_v23 = vmax.f32 %v2642_v52, 0.0  ;;  %v2651_v0 = vmax.f32 %v2643_v47, 0.0  ;;  %v2652_v62 = vmax.f32 %v2644_v21, 0.0  ;;  %v2653_v11 = vmax.f32 %v2645_v24, 0.0 }
 0x1ca   :  { %v2654_v26 = vmax.f32 %v2646_v57, 0.0  ;;  %v2655_v63 = vmax.f32 %v2647_v42, 0.0  ;;  %v2782_v58 = vrot.slane %v3706_v10, %v3676_v3  ;;  %v2656_v43 = vmax.f32 %v2648_v37, 0.0 }
 0x1cb   :  { %v2736_v61 = vmul.f32 %v2707_v44, %v2650_v23  ;;  %v2737_v35 = vmul.f32 %v2711_v45, %v2651_v0  ;;  %v2738_v18 = vmul.f32 %v2715_v46, %v2652_v62  ;;  %v2827_v28 = vmul.f32 %v2798_v32, %v2650_v23 }
 0x1cc   :  { %v2828_v41 = vmul.f32 %v2802_v13, %v2651_v0  ;;  %v2814_v44 = vrot.slane %v2774_v49, %v3668_v55  ;;  %v2739_v45 = vmul.f32 %v2719_v48, %v2653_v11  ;;  %v2829_v2 = vmul.f32 %v2806_v12, %v2652_v62 }
 0x1cd   :  { %v2744_v16 = vadd.f32 %v2737_v35, %v2736_v61  ;;  %v2818_v46 = vrot.slane %v2778_v15, %v3668_v55  ;;  %v2740_v4 = vmul.f32 %v2723_v53, %v2654_v26  ;;  %v2830_v30 = vmul.f32 %v2810_v38, %v2653_v11 }
 0x1ce   :  { %v2835_v7 = vadd.f32 %v2828_v41, %v2827_v28  ;;  %v2657_v5 = vmax.f32 %v2649_v22, 0.0  ;;  %v2735_v3 = vrot.slane %v2695_v40, %v3666_v50  ;;  %v2786_v48 = vrot.slane %v3706_v10, %v3680_v17  ;;  %v2869_v22 = vld [vmem:[%s3804_s4 + $0x1] sm:$0x1] }
 0x1cf   :  { %v2745_v29 = vadd.f32 %v2744_v16, %v2738_v18  ;;  %v2822_v31 = vrot.slane %v2782_v58, %v3668_v55  ;;  %v2741_v60 = vmul.f32 %v3730_v33, %v2655_v63  ;;  %v2831_v6 = vmul.f32 %v2814_v44, %v2654_v26  ;;  %v2865_v16 = vld [vmem:[%s3804_s4] sm:$0x1] }
 0x1d0   :  { %v2836_v14 = vadd.f32 %v2835_v7, %v2829_v2  ;;  %v2742_v53 = vmul.f32 %v2731_v1, %v2656_v43  ;;  %v2832_v19 = vmul.f32 %v2818_v46, %v2655_v63  ;;  %v2826_v49 = vrot.slane %v2786_v48, %v3668_v55 }
 0x1d1   :  { %v2746_v51 = vadd.f32 %v2745_v29, %v2739_v45  ;;  %v2743_v52 = vmul.f32 %v2735_v3, %v2657_v5  ;;  %v2833_v8 = vmul.f32 %v2822_v31, %v2656_v43  ;;  %v2661_v33 = vand.u32 127, %v2439_v34 }
 0x1d2   :  { %v2837_v59 = vadd.f32 %v2836_v14, %v2830_v30  ;;  %v2834_v17 = vmul.f32 %v2826_v49, %v2657_v5 }
 0x1d3   :  { %v2747_v39 = vadd.f32 %v2746_v51, %v2740_v4  ;;  %vm2753_vm1 = vcmp.eq.s32.totalorder %v2661_v33, 0  ;;  %vm2844_vm2 = vcmp.eq.s32.totalorder %v2661_v33, 1 }
 0x1d4   :  { %v2838_v54 = vadd.f32 %v2837_v59, %v2831_v6 }
 0x1d5   :  { %v2748_v20 = vadd.f32 %v2747_v39, %v2741_v60 }
 0x1d6   :  { %v2839_v40 = vadd.f32 %v2838_v54, %v2832_v19 }
 0x1d7   :  { %v2749_v47 = vadd.f32 %v2748_v20, %v2742_v53 }
 0x1d8   :  { %v2840_v24 = vadd.f32 %v2839_v40, %v2833_v8 }
 0x1d9   :  { %v2750_v21 = vadd.f32 %v2749_v47, %v2743_v52 }
 0x1da   :  { %v2841_v10 = vadd.f32 %v2840_v24, %v2834_v17 }
 0x1db   :  { %2751 = vadd.xlane.f32.xlu0 %v2750_v21 }
 0x1df   :  { %2842 = vadd.xlane.f32.xlu0 %v2841_v10 }
 0x264   :  { %v2752_v25 = vpop.xlane.xlu0 %2751 }
 0x265   :  { %v2754_v56 = vsel %vm2753_vm1, %v2752_v25, 0.0 }
 0x268   :  { %v2843_v57 = vpop.xlane.xlu0 %2842 }
 0x269   :  { %v2845_v32 = vsel %vm2844_vm2, %v2843_v57, %v2754_v56 }
 0x26a   :  { %v2847_v55 = vsel %vm2846_vm3, %v2845_v32, 0.0 }
 0x26b   :  { %v2848_v23 = vrot.slane %v2847_v55, 4 }
 0x26d   :  { %v2849_v0 = vadd.f32 %v2848_v23, %v2847_v55 }
 0x26f   :  { %v2850_v62 = vrot.slane %v2849_v0, 2 }
 0x271   :  { %v2851_v13 = vadd.f32 %v2850_v62, %v2849_v0 }
 0x273   :  { %v2852_v9 = vrot.slane %v2851_v13, 1 }
 0x275   :  { %v2853_v27 = vadd.f32 %v2852_v9, %v2851_v13 }
 0x277   :  { %v2854_v42 = vmul.f32 0.125, %v2853_v27 }
 0x279   :  { %v2855_v15 = vsub.f32 %v2845_v32, %v2854_v42 }
 0x27b   :  { %v2856_v11 = vmul.f32 %v2855_v15, %v2855_v15 }
 0x27d   :  { %v2857_v34 = vsel %vm2846_vm3, %v2856_v11, 0.0 }
 0x27e   :  { %v2858_v61 = vrot.slane %v2857_v34, 4 }
 0x280   :  { %v2859_v35 = vadd.f32 %v2858_v61, %v2857_v34 }
 0x282   :  { %v2860_v12 = vrot.slane %v2859_v35, 2 }
 0x284   :  { %v2861_v36 = vadd.f32 %v2860_v12, %v2859_v35 }
 0x286   :  { %v2862_v37 = vrot.slane %v2861_v36, 1 }
 0x288   :  { %v2863_v26 = vadd.f32 %v2862_v37, %v2861_v36 }
 0x28a   :  { %v2864_v38 = vmul.f32 0.125, %v2863_v26 }
 0x28c   :  { %v2866_v18 = vadd.f32 1e-05, %v2864_v38 }
 0x28e   :  { %2926 = vrsqrt.f32 %v2866_v18 }
 0x29b   :  { %v2927_v28 = vpop.eup %2926 }
 0x29c   :  { %v2868_v41 = vmul.f32 %v2927_v28, %v2865_v16 }
 0x29e   :  { %v2870_v63 = vmul.f32 %v2868_v41, %v2854_v42  ;;  %v2875_v58 = vrot.slane %v2868_v41, %v3666_v50 }
 0x2a0   :  { %v2871_v44 = vsub.f32 %v2869_v22, %v2870_v63  ;;  %v2876_v45 = vmul.f32 %v2875_v58, %v2845_v32 }
 0x2a2   :  { %v2880_v29 = vrot.slane %v2871_v44, %v3666_v50 }
 0x2a4   :  { %v2881_v2 = vadd.f32 %v2880_v29, %v2876_v45 }
 0x2a6   :  { %v2882_v7 = vmax.f32 %v2881_v2, 0.0 }
 0x2a8   :  { %v2883_v43 = vsel %vm2846_vm3, %v2882_v7, -inf }
 0x2a9   :  { %2884 = vmax.xlane.f32.xlu1 %v2883_v43 }
 0x332   :  { %v2885_v1 = vpop.xlane.xlu1 %2884 }
 0x333   :  { %v2886_v46 = vsub.f32 %v2882_v7, %v2885_v1 }
 0x335   :  { %v2887_v4 = vmul.f32 1.442695, %v2886_v46 }
 0x337   :  { %2928 = vpow2.f32 %v2887_v4 }
 0x344   :  { %v2929_v51 = vpop.eup %2928 }
 0x345   :  { %v2889_v30 = vsel %vm2846_vm3, %v2929_v51, 0.0 }
 0x346   :  { %2890 = vadd.xlane.f32.xlu1 %v2889_v30 }
 0x3cf   :  { %v2891_v14 = vpop.xlane.xlu1 %2890 }
 0x3d0   :  { %2930 = vrcp.f32 %v2891_v14 }
 0x3dd   :  { %v2931_v5 = vpop.eup %2930 }
 0x3de   :  { %v2893_v3 = vmul.f32 %v2931_v5, %v2929_v51 }
 0x3e0   :  { %2894 = vst.msk [vmem:[%s3805_s5] sm:$0xff] %vm2846_vm3, %v2893_v3 }
 0x3e1   :  { %2899 = vsyncpa [#allocation3], 1 }
 0x3e2   :  { %2900 = vsyncpa [#allocation5], 1 }
 0x3e3   :  { %2901 = vsyncpa [#allocation8], 1 }

</bundles_post_ra>
